<compile_context>
chip_gen: v7x
topology: tpu7x:2x2x1
jax: 0.10.0
libtpu: 0.0.40
codegen_flags: <defaults>
</compile_context>

<pallas_src>
import jax
import jax.numpy as jnp
from jax.experimental import pallas as pl
from jax.experimental.pallas import tpu as pltpu

# ---- small CLIP-text-transformer hyperparameters -------------------------
VOCAB = 64          # vocab size
CTX = 8             # context length L
WIDTH = 32          # transformer width D
HEADS = 4
HEAD_DIM = WIDTH // HEADS
LAYERS = 2
EMBED = 32          # text_projection output dim
LN_EPS = 1e-5
NEG_INF = -1e9      # stands in for float('-inf') in the causal attn mask

SLAB_LANES = 128                       # lane-dense slab width
assert 4 * WIDTH <= SLAB_LANES and WIDTH <= SLAB_LANES and EMBED <= SLAB_LANES

# f32 vector-slab layout: 7 rows per layer + 2 final rows (ln_final)
V_LN1_G, V_LN1_B, V_B_OUT, V_LN2_G, V_LN2_B, V_B_PROJ, V_B_FC = range(7)
VEC_ROWS_PER_LAYER = 7
# bf16 MLP-slab layout: per layer  w_fc (WIDTH rows) | w_proj (4*WIDTH rows)
MLP_ROWS_PER_LAYER = WIDTH + 4 * WIDTH
TPROJ_ROW = LAYERS * MLP_ROWS_PER_LAYER


def _layer_norm(x, g, b):
    mu = jnp.mean(x, axis=-1, keepdims=True)
    xc = x - mu
    var = jnp.mean(xc * xc, axis=-1, keepdims=True)
    return xc * jax.lax.rsqrt(var + LN_EPS) * g + b


def _quick_gelu(x):
    # CLIP's QuickGELU
    return x * jax.nn.sigmoid(1.702 * x)


# ---------------------------------------------------------------------------
# One fused kernel per sequence: all residual blocks + ln_final + EOS select
# + text projection.  Grid = (N,), "parallel".
# ---------------------------------------------------------------------------
def fused_clip_text_kernel(
        x_ref,        # (1, L, D)            f32   embeddings (+pos) for one sequence
        sel_ref,      # (1, L, 1)            f32   one-hot EOS-row selector
        vec_ref,      # (LAYERS*7+2, 128)    f32   LN gains/biases + linear biases
        bqv_ref,      # (LAYERS*2, H, 1, F)  f32   per-head q (scaled) / v biases
        wqkv_ref,     # (LAYERS, H, D, 3F)   bf16  merged per-head qkv weights
        wo_ref,       # (LAYERS, H, F, D)    bf16  per-head out-proj weights
        mlp_ref,      # (LAYERS*160+32, 128) bf16  w_fc | w_proj | text_projection
        o_ref,        # (1, 1, E)            f32
):
    x = x_ref[0]            # (L, D) f32, kept live across layers
    sel = sel_ref[0]        # (L, 1) f32

    # Causal mask built in-kernel (no DMA), hoisted out of the layer loop.
    r = jax.lax.broadcasted_iota(jnp.int32, (CTX, CTX), 0)
    c = jax.lax.broadcasted_iota(jnp.int32, (CTX, CTX), 1)
    mask = jnp.where(c <= r, 0.0, NEG_INF).astype(jnp.float32)         # (L, L)

    for l in range(LAYERS):                    # static unrolled layer loop
        vb = l * VEC_ROWS_PER_LAYER
        ln1_g = vec_ref[vb + V_LN1_G:vb + V_LN1_G + 1, :WIDTH]
        ln1_b = vec_ref[vb + V_LN1_B:vb + V_LN1_B + 1, :WIDTH]
        b_out = vec_ref[vb + V_B_OUT:vb + V_B_OUT + 1, :WIDTH]
        ln2_g = vec_ref[vb + V_LN2_G:vb + V_LN2_G + 1, :WIDTH]
        ln2_b = vec_ref[vb + V_LN2_B:vb + V_LN2_B + 1, :WIDTH]
        b_pr = vec_ref[vb + V_B_PROJ:vb + V_B_PROJ + 1, :WIDTH]
        b_fc = vec_ref[vb + V_B_FC:vb + V_B_FC + 1, :4 * WIDTH]

        mb = l * MLP_ROWS_PER_LAYER
        w_fc = mlp_ref[mb:mb + WIDTH, :4 * WIDTH]                       # (D, 4D)
        w_pr = mlp_ref[mb + WIDTH:mb + MLP_ROWS_PER_LAYER, :WIDTH]      # (4D, D)

        b_q = bqv_ref[2 * l]                   # (H, 1, F), scale already folded in
        b_v = bqv_ref[2 * l + 1]               # (H, 1, F)

        # ---------------- multi-head self-attention ----------------
        h = _layer_norm(x, ln1_g, ln1_b)                                # (L, D) f32
        # cast to bf16 BEFORE broadcasting across heads
        hb = jnp.broadcast_to(h.astype(jnp.bfloat16), (HEADS, CTX, WIDTH))

        # single merged per-head QKV projection (one batched MXU contraction)
        qkv = jnp.einsum('hnd,hdf->hnf', hb, wqkv_ref[l],
                         preferred_element_type=jnp.float32)            # (H, L, 3F)
        q = qkv[:, :, :HEAD_DIM] + b_q
        # K bias dropped: softmax is exactly invariant to a per-query constant.
        k = qkv[:, :, HEAD_DIM:2 * HEAD_DIM]
        v = qkv[:, :, 2 * HEAD_DIM:] + b_v

        s = jnp.einsum('hqf,hkf->hqk',
                       q.astype(jnp.bfloat16), k.astype(jnp.bfloat16),
                       preferred_element_type=jnp.float32) + mask       # (H, L, L)
        s = s - jnp.max(s, axis=-1, keepdims=True)
        p = jnp.exp(s)
        p = p * pl.reciprocal(jnp.sum(p, axis=-1, keepdims=True), approx=True)

        o_h = jnp.einsum('hqk,hkf->hqf',
                         p.astype(jnp.bfloat16), v.astype(jnp.bfloat16),
                         preferred_element_type=jnp.float32)            # (H, L, F)

        # output projection: batched per head, then summed over heads
        attn = jnp.einsum('hnf,hfd->hnd',
                          o_h.astype(jnp.bfloat16), wo_ref[l],
                          preferred_element_type=jnp.float32)           # (H, L, D)
        attn = jnp.sum(attn, axis=0)                                    # (L, D)
        x = x + attn + b_out

        # ---------------- MLP (c_fc -> QuickGELU -> c_proj) ----------------
        h = _layer_norm(x, ln2_g, ln2_b)
        h1 = jnp.dot(h.astype(jnp.bfloat16), w_fc,
                     preferred_element_type=jnp.float32) + b_fc
        h1 = _quick_gelu(h1)
        h2 = jnp.dot(h1.astype(jnp.bfloat16), w_pr,
                     preferred_element_type=jnp.float32) + b_pr
        x = x + h2

    # -------- ln_final + exact EOS-row select + text projection --------
    fbase = LAYERS * VEC_ROWS_PER_LAYER
    lnf_g = vec_ref[fbase:fbase + 1, :WIDTH]
    lnf_b = vec_ref[fbase + 1:fbase + 2, :WIDTH]
    xf = _layer_norm(x, lnf_g, lnf_b)                                   # (L, D) f32
    eos_row = jnp.sum(xf * sel, axis=0, keepdims=True)                  # (1, D) exact
    tproj = mlp_ref[TPROJ_ROW:TPROJ_ROW + WIDTH, :EMBED]                # (D, E) bf16
    o_ref[0] = jnp.dot(eos_row.astype(jnp.bfloat16), tproj,
                       preferred_element_type=jnp.float32)              # (1, E)


# ---------------------------------------------------------------------------
# Parameter preparation: pack into a few lane-dense slabs, split heads,
# fold the 1/sqrt(HEAD_DIM) scale, drop the K bias, cast weights to bf16.
# ---------------------------------------------------------------------------
def prepare_kernel_params(params):
    layers = params['layers']
    scale = HEAD_DIM ** -0.5
    bf16 = jnp.bfloat16

    def split_heads_w(w):    # (D, D) -> (H, D, F)
        return w.reshape(WIDTH, HEADS, HEAD_DIM).transpose(1, 0, 2)

    def split_heads_b(b):    # (1, D) -> (H, 1, F)
        return b.reshape(1, HEADS, HEAD_DIM).transpose(1, 0, 2)

    def pad_lanes(a):        # (rows, n) -> (rows, SLAB_LANES)
        return jnp.pad(a, ((0, 0), (0, SLAB_LANES - a.shape[-1])))

    wqkv_l, wo_l, bqv_l, vec_rows, mlp_rows = [], [], [], [], []
    for p in layers:
        wq = split_heads_w(p['w_qkv'][:, :WIDTH]) * scale
        wk = split_heads_w(p['w_qkv'][:, WIDTH:2 * WIDTH])
        wv = split_heads_w(p['w_qkv'][:, 2 * WIDTH:])
        wqkv_l.append(jnp.concatenate([wq, wk, wv], axis=-1))       # (H, D, 3F)

        wo_l.append(p['w_out'].reshape(HEADS, HEAD_DIM, WIDTH))     # (H, F, D)

        bq = split_heads_b(p['b_qkv'][:, :WIDTH]) * scale
        bv = split_heads_b(p['b_qkv'][:, 2 * WIDTH:])
        # K bias intentionally dropped (exact no-op under softmax).
        bqv_l.append(jnp.stack([bq, bv], axis=0))                   # (2, H, 1, F)

        vec_rows += [pad_lanes(p['ln1_g']), pad_lanes(p['ln1_b']),
                     pad_lanes(p['b_out']),
                     pad_lanes(p['ln2_g']), pad_lanes(p['ln2_b']),
                     pad_lanes(p['b_proj']), pad_lanes(p['b_fc'])]

        mlp_rows += [pad_lanes(p['w_fc']), pad_lanes(p['w_proj'])]

    vec_rows += [pad_lanes(params['lnf_g']), pad_lanes(params['lnf_b'])]
    mlp_rows += [pad_lanes(params['text_proj'])]

    return dict(
        wqkv=jnp.stack(wqkv_l).astype(bf16),                        # (LAYERS, H, D, 3F)
        wo=jnp.stack(wo_l).astype(bf16),                            # (LAYERS, H, F, D)
        bqv=jnp.concatenate(bqv_l, axis=0).astype(jnp.float32),     # (LAYERS*2, H, 1, F)
        vec_slab=jnp.concatenate(vec_rows, axis=0).astype(jnp.float32),
        mlp_slab=jnp.concatenate(mlp_rows, axis=0).astype(bf16),
    )


# ---------------------------------------------------------------------------
# Full forward: embedding gather + pos-emb in plain JAX, rest in one kernel.
# ---------------------------------------------------------------------------
def clip_text_encoder_forward(params, token_ids):
    N, L = token_ids.shape
    kp = prepare_kernel_params(params)   # cheap; could be cached outside jit

    # token_embedding(token_ids) + positional_embedding   (enable_pos_emb=True)
    x = (params['tok_emb'][token_ids] + params['pos_emb'][None]).astype(jnp.float32)

    eos = jnp.argmax(token_ids, axis=-1)
    sel = jax.nn.one_hot(eos, L, dtype=jnp.float32)[:, :, None]     # (N, L, 1)

    grid_spec = pltpu.PrefetchScalarGridSpec(
        num_scalar_prefetch=0,
        grid=(N,),                       # one sequence per step; parallel on v7x's 2 TCs
        in_specs=[
            pl.BlockSpec((1, L, WIDTH), lambda i: (i, 0, 0)),
            pl.BlockSpec((1, L, 1), lambda i: (i, 0, 0)),
            # weight/bias slabs: constant block index -> fetched once, stay resident
            pl.BlockSpec(kp['vec_slab'].shape, lambda i: (0, 0)),
            pl.BlockSpec(kp['bqv'].shape, lambda i: (0, 0, 0, 0)),
            pl.BlockSpec(kp['wqkv'].shape, lambda i: (0, 0, 0, 0)),
            pl.BlockSpec(kp['wo'].shape, lambda i: (0, 0, 0, 0)),
            pl.BlockSpec(kp['mlp_slab'].shape, lambda i: (0, 0)),
        ],
        out_specs=pl.BlockSpec((1, 1, EMBED), lambda i: (i, 0, 0)),
    )

    out = pl.pallas_call(
        fused_clip_text_kernel,
        out_shape=jax.ShapeDtypeStruct((N, 1, EMBED), jnp.float32),
        grid_spec=grid_spec,
        compiler_params=pltpu.CompilerParams(
            dimension_semantics=("parallel",),
            vmem_limit_bytes=32 * 1024 * 1024,
        ),
    )(x, sel, kp['vec_slab'], kp['bqv'], kp['wqkv'], kp['wo'], kp['mlp_slab'])
    return out.reshape(N, EMBED)


# ---------------------------------------------------------------------------
# Pure-JAX f32 reference (mirrors the PyTorch math) for a correctness check.
# ---------------------------------------------------------------------------
def reference_forward(params, token_ids):
    x = params['tok_emb'][token_ids] + params['pos_emb'][None, :, :]
    N, L, D = x.shape
    for p in params['layers']:
        h = _layer_norm(x, p['ln1_g'], p['ln1_b'])
        qkv = h @ p['w_qkv'] + p['b_qkv']
        q, k, v = jnp.split(qkv, 3, axis=-1)
        q = q.reshape(N, L, HEADS, HEAD_DIM).transpose(0, 2, 1, 3) * HEAD_DIM ** -0.5
        k = k.reshape(N, L, HEADS, HEAD_DIM).transpose(0, 2, 1, 3)
        v = v.reshape(N, L, HEADS, HEAD_DIM).transpose(0, 2, 1, 3)
        s = q @ k.transpose(0, 1, 3, 2) + params['mask'][None, None]
        a = jax.nn.softmax(s, axis=-1) @ v
        a = a.transpose(0, 2, 1, 3).reshape(N, L, D)
        x = x + a @ p['w_out'] + p['b_out']
        h = _layer_norm(x, p['ln2_g'], p['ln2_b'])
        h = _quick_gelu(h @ p['w_fc'] + p['b_fc'])
        x = x + h @ p['w_proj'] + p['b_proj']
    x = _layer_norm(x, params['lnf_g'], params['lnf_b'])
    eos = jnp.argmax(token_ids, axis=-1)
    return x[jnp.arange(N), eos] @ params['text_proj']


# ---------------------------------------------------------------------------
# Deterministic parameter construction (non-zero biases so the folded / dropped
# bias paths in the kernel are actually exercised).
# ---------------------------------------------------------------------------
def init_params(key):
    ks = iter(jax.random.split(key, 64))
    nrm = lambda shape, s: jax.random.normal(next(ks), shape, jnp.float32) * s

    layers = []
    for _ in range(LAYERS):
        layers.append(dict(
            ln1_g=1.0 + nrm((1, WIDTH), 0.05),
            ln1_b=nrm((1, WIDTH), 0.05),
            w_qkv=nrm((WIDTH, 3 * WIDTH), 0.02),
            b_qkv=nrm((1, 3 * WIDTH), 0.02),
            w_out=nrm((WIDTH, WIDTH), 0.02),
            b_out=nrm((1, WIDTH), 0.02),
            ln2_g=1.0 + nrm((1, WIDTH), 0.05),
            ln2_b=nrm((1, WIDTH), 0.05),
            w_fc=nrm((WIDTH, 4 * WIDTH), 0.02),
            b_fc=nrm((1, 4 * WIDTH), 0.02),
            w_proj=nrm((4 * WIDTH, WIDTH), 0.02),
            b_proj=nrm((1, WIDTH), 0.02),
        ))

    # causal attention mask used by CLIP's text transformer (for the reference)
    causal = jnp.tril(jnp.ones((CTX, CTX), jnp.bool_))
    mask = jnp.where(causal, 0.0, NEG_INF).astype(jnp.float32)

    return dict(
        tok_emb=nrm((VOCAB, WIDTH), 0.02),
        pos_emb=nrm((CTX, WIDTH), 0.01),
        lnf_g=1.0 + nrm((1, WIDTH), 0.05),
        lnf_b=nrm((1, WIDTH), 0.05),
        text_proj=nrm((WIDTH, EMBED), WIDTH ** -0.5),
        mask=mask,
        layers=layers,
    )


if __name__ == "__main__":
    key = jax.random.PRNGKey(0)
    params = init_params(key)

    # deterministic token ids (N=2 prompts, context length CTX=8)
    token_ids = jax.random.randint(jax.random.PRNGKey(1), (2, CTX), 0, VOCAB,
                                   dtype=jnp.int32)

    fwd = jax.jit(clip_text_encoder_forward)
    tf = jax.block_until_ready(fwd(params, token_ids))

    ref = jax.block_until_ready(reference_forward(params, token_ids))
    assert tf.shape == (2, EMBED)
    # bf16 matmul operands + approx softmax reciprocal => looser tolerance than
    # the pure-f32 reference (the PyTorch reference itself runs in fp16).
    err = float(jnp.max(jnp.abs(tf - ref)))
    assert jnp.allclose(tf, ref, atol=5e-2, rtol=5e-2), f"max abs err {err}"

    print("KERNEL_OK")
</pallas_src>

<mosaic_0001>
module attributes {stable_mosaic.version = 11 : i64} {
  func.func @fused_clip_text_kernel(%arg0: i32, %arg1: memref<1x8x32xf32, #tpu.memory_space<vmem>>, %arg2: memref<1x8x1xf32, #tpu.memory_space<vmem>>, %arg3: memref<16x128xf32, #tpu.memory_space<vmem>>, %arg4: memref<4x4x1x8xf32, #tpu.memory_space<vmem>>, %arg5: memref<2x4x32x24xbf16, #tpu.memory_space<vmem>>, %arg6: memref<2x4x8x32xbf16, #tpu.memory_space<vmem>>, %arg7: memref<352x128xbf16, #tpu.memory_space<vmem>>, %arg8: memref<1x1x32xf32, #tpu.memory_space<vmem>>) attributes {dimension_semantics = [#tpu.dimension_semantics<parallel>], iteration_bounds = array<i64: 2>, scalar_prefetch = 0 : i64, scratch_operands = 0 : i64, tpu.core_type = #tpu.core_type<tc>, window_params = [{transform_indices = @transform_0, window_bounds = array<i64: 1, 8, 32>}, {transform_indices = @transform_1, window_bounds = array<i64: 1, 8, 1>}, {pipeline_mode = #tpu.pipeline_mode<synchronous>, transform_indices = @transform_2, window_bounds = array<i64: 16, 128>}, {pipeline_mode = #tpu.pipeline_mode<synchronous>, transform_indices = @transform_3, window_bounds = array<i64: 4, 4, 1, 8>}, {pipeline_mode = #tpu.pipeline_mode<synchronous>, transform_indices = @transform_4, window_bounds = array<i64: 2, 4, 32, 24>}, {pipeline_mode = #tpu.pipeline_mode<synchronous>, transform_indices = @transform_5, window_bounds = array<i64: 2, 4, 8, 32>}, {pipeline_mode = #tpu.pipeline_mode<synchronous>, transform_indices = @transform_6, window_bounds = array<i64: 352, 128>}, {transform_indices = @transform_7, window_bounds = array<i64: 1, 1, 32>}]} {
    %c0 = arith.constant 0 : index
    %c0_0 = arith.constant 0 : index
    %c0_1 = arith.constant 0 : index
    %0 = vector.load %arg1[%c0, %c0_0, %c0_1] : memref<1x8x32xf32, #tpu.memory_space<vmem>>, vector<1x8x32xf32>
    %1 = vector.shape_cast %0 : vector<1x8x32xf32> to vector<8x32xf32>
    %c0_2 = arith.constant 0 : index
    %c0_3 = arith.constant 0 : index
    %c0_4 = arith.constant 0 : index
    %2 = vector.load %arg2[%c0_2, %c0_3, %c0_4] : memref<1x8x1xf32, #tpu.memory_space<vmem>>, vector<1x8x1xf32>
    %3 = vector.shape_cast %2 : vector<1x8x1xf32> to vector<8x1xf32>
    %4 = tpu.iota {dimensions = array<i32: 0>} : vector<8x8xi32>
    %5 = tpu.iota {dimensions = array<i32: 1>} : vector<8x8xi32>
    %6 = arith.cmpi sle, %5, %4 : vector<8x8xi32>
    %cst = arith.constant 0.000000e+00 : f32
    %cst_5 = arith.constant -1.000000e+09 : f32
    %7 = vector.broadcast %cst : f32 to vector<8x8xf32>
    %8 = vector.broadcast %cst_5 : f32 to vector<8x8xf32>
    %9 = arith.select %6, %7, %8 : vector<8x8xi1>, vector<8x8xf32>
    %c0_6 = arith.constant 0 : index
    %c0_7 = arith.constant 0 : index
    %10 = vector.load %arg3[%c0_6, %c0_7] : memref<16x128xf32, #tpu.memory_space<vmem>>, vector<1x32xf32>
    %c1 = arith.constant 1 : index
    %c0_8 = arith.constant 0 : index
    %11 = vector.load %arg3[%c1, %c0_8] : memref<16x128xf32, #tpu.memory_space<vmem>>, vector<1x32xf32>
    %c2 = arith.constant 2 : index
    %c0_9 = arith.constant 0 : index
    %12 = vector.load %arg3[%c2, %c0_9] : memref<16x128xf32, #tpu.memory_space<vmem>>, vector<1x32xf32>
    %c3 = arith.constant 3 : index
    %c0_10 = arith.constant 0 : index
    %13 = vector.load %arg3[%c3, %c0_10] : memref<16x128xf32, #tpu.memory_space<vmem>>, vector<1x32xf32>
    %c4 = arith.constant 4 : index
    %c0_11 = arith.constant 0 : index
    %14 = vector.load %arg3[%c4, %c0_11] : memref<16x128xf32, #tpu.memory_space<vmem>>, vector<1x32xf32>
    %c5 = arith.constant 5 : index
    %c0_12 = arith.constant 0 : index
    %15 = vector.load %arg3[%c5, %c0_12] : memref<16x128xf32, #tpu.memory_space<vmem>>, vector<1x32xf32>
    %c6 = arith.constant 6 : index
    %c0_13 = arith.constant 0 : index
    %16 = vector.load %arg3[%c6, %c0_13] : memref<16x128xf32, #tpu.memory_space<vmem>>, vector<1x128xf32>
    %c0_14 = arith.constant 0 : index
    %c0_15 = arith.constant 0 : index
    %17 = vector.load %arg7[%c0_14, %c0_15] : memref<352x128xbf16, #tpu.memory_space<vmem>>, vector<32x128xbf16>
    %c32 = arith.constant 32 : index
    %c0_16 = arith.constant 0 : index
    %18 = vector.load %arg7[%c32, %c0_16] : memref<352x128xbf16, #tpu.memory_space<vmem>>, vector<128x32xbf16>
    %c0_17 = arith.constant 0 : index
    %c0_18 = arith.constant 0 : index
    %c0_19 = arith.constant 0 : index
    %c0_20 = arith.constant 0 : index
    %19 = vector.load %arg4[%c0_17, %c0_18, %c0_19, %c0_20] : memref<4x4x1x8xf32, #tpu.memory_space<vmem>>, vector<1x4x1x8xf32>
    %20 = vector.shape_cast %19 : vector<1x4x1x8xf32> to vector<4x1x8xf32>
    %c1_21 = arith.constant 1 : index
    %c0_22 = arith.constant 0 : index
    %c0_23 = arith.constant 0 : index
    %c0_24 = arith.constant 0 : index
    %21 = vector.load %arg4[%c1_21, %c0_22, %c0_23, %c0_24] : memref<4x4x1x8xf32, #tpu.memory_space<vmem>>, vector<1x4x1x8xf32>
    %22 = vector.shape_cast %21 : vector<1x4x1x8xf32> to vector<4x1x8xf32>
    %cst_25 = arith.constant dense<0.000000e+00> : vector<8xf32>
    %23 = vector.multi_reduction <add>, %1, %cst_25 [1] : vector<8x32xf32> to vector<8xf32>
    %24 = vector.shape_cast %23 : vector<8xf32> to vector<8x1xf32>
    %cst_26 = arith.constant 3.200000e+01 : f32
    %25 = vector.broadcast %cst_26 : f32 to vector<8x1xf32>
    %26 = arith.divf %24, %25 : vector<8x1xf32>
    %27 = vector.broadcast %26 : vector<8x1xf32> to vector<8x32xf32>
    %28 = arith.subf %1, %27 : vector<8x32xf32>
    %29 = arith.mulf %28, %28 : vector<8x32xf32>
    %cst_27 = arith.constant dense<0.000000e+00> : vector<8xf32>
    %30 = vector.multi_reduction <add>, %29, %cst_27 [1] : vector<8x32xf32> to vector<8xf32>
    %31 = vector.shape_cast %30 : vector<8xf32> to vector<8x1xf32>
    %cst_28 = arith.constant 3.200000e+01 : f32
    %32 = vector.broadcast %cst_28 : f32 to vector<8x1xf32>
    %33 = arith.divf %31, %32 : vector<8x1xf32>
    %cst_29 = arith.constant 9.99999974E-6 : f32
    %34 = vector.broadcast %cst_29 : f32 to vector<8x1xf32>
    %35 = arith.addf %33, %34 : vector<8x1xf32>
    %36 = math.rsqrt %35 : vector<8x1xf32>
    %37 = vector.broadcast %36 : vector<8x1xf32> to vector<8x32xf32>
    %38 = arith.mulf %28, %37 : vector<8x32xf32>
    %39 = vector.broadcast %10 : vector<1x32xf32> to vector<8x32xf32>
    %40 = arith.mulf %38, %39 : vector<8x32xf32>
    %41 = vector.broadcast %11 : vector<1x32xf32> to vector<8x32xf32>
    %42 = arith.addf %40, %41 : vector<8x32xf32>
    %43 = arith.truncf %42 : vector<8x32xf32> to vector<8x32xbf16>
    %44 = vector.shape_cast %43 : vector<8x32xbf16> to vector<1x8x32xbf16>
    %45 = vector.broadcast %44 : vector<1x8x32xbf16> to vector<4x8x32xbf16>
    %c0_30 = arith.constant 0 : index
    %c0_31 = arith.constant 0 : index
    %c0_32 = arith.constant 0 : index
    %c0_33 = arith.constant 0 : index
    %46 = vector.load %arg5[%c0_30, %c0_31, %c0_32, %c0_33] : memref<2x4x32x24xbf16, #tpu.memory_space<vmem>>, vector<1x4x32x24xbf16>
    %47 = vector.shape_cast %46 : vector<1x4x32x24xbf16> to vector<4x32x24xbf16>
    "tpu.trace_start"() <{level = 10 : i32, message = "hnd,hdf->hnf"}> : () -> ()
    %cst_34 = arith.constant dense<0.000000e+00> : vector<4x8x24xf32>
    %48 = tpu.matmul %45, %47, %cst_34 {dimension_numbers = #tpu.dot_dimension_numbers<[2], [1], [1], [2], [0, 0, 0, 1, 1, 2], [0], [0]>} : vector<4x8x32xbf16>, vector<4x32x24xbf16>, vector<4x8x24xf32> -> vector<4x8x24xf32>
    "tpu.trace_stop"() : () -> ()
    %49 = vector.extract_strided_slice %48 {offsets = [0, 0, 0], sizes = [4, 8, 8], strides = [1, 1, 1]} : vector<4x8x24xf32> to vector<4x8x8xf32>
    %50 = vector.broadcast %20 : vector<4x1x8xf32> to vector<4x8x8xf32>
    %51 = arith.addf %49, %50 : vector<4x8x8xf32>
    %52 = vector.extract_strided_slice %48 {offsets = [0, 0, 8], sizes = [4, 8, 8], strides = [1, 1, 1]} : vector<4x8x24xf32> to vector<4x8x8xf32>
    %53 = vector.extract_strided_slice %48 {offsets = [0, 0, 16], sizes = [4, 8, 8], strides = [1, 1, 1]} : vector<4x8x24xf32> to vector<4x8x8xf32>
    %54 = vector.broadcast %22 : vector<4x1x8xf32> to vector<4x8x8xf32>
    %55 = arith.addf %53, %54 : vector<4x8x8xf32>
    %56 = arith.truncf %51 : vector<4x8x8xf32> to vector<4x8x8xbf16>
    %57 = arith.truncf %52 : vector<4x8x8xf32> to vector<4x8x8xbf16>
    "tpu.trace_start"() <{level = 10 : i32, message = "hqf,hkf->hqk"}> : () -> ()
    %cst_35 = arith.constant dense<0.000000e+00> : vector<4x8x8xf32>
    %58 = tpu.matmul %56, %57, %cst_35 {dimension_numbers = #tpu.dot_dimension_numbers<[2], [2], [1], [1], [0, 0, 0, 1, 1, 1], [0], [0]>} : vector<4x8x8xbf16>, vector<4x8x8xbf16>, vector<4x8x8xf32> -> vector<4x8x8xf32>
    "tpu.trace_stop"() : () -> ()
    %59 = vector.shape_cast %9 : vector<8x8xf32> to vector<1x8x8xf32>
    %60 = vector.broadcast %59 : vector<1x8x8xf32> to vector<4x8x8xf32>
    %61 = arith.addf %58, %60 : vector<4x8x8xf32>
    %cst_36 = arith.constant dense<0xFF800000> : vector<4x8xf32>
    %62 = vector.multi_reduction <maximumf>, %61, %cst_36 [2] : vector<4x8x8xf32> to vector<4x8xf32>
    %63 = vector.shape_cast %62 : vector<4x8xf32> to vector<4x8x1xf32>
    %64 = vector.broadcast %63 : vector<4x8x1xf32> to vector<4x8x8xf32>
    %65 = arith.subf %61, %64 : vector<4x8x8xf32>
    %66 = math.exp %65 : vector<4x8x8xf32>
    %cst_37 = arith.constant dense<0.000000e+00> : vector<4x8xf32>
    %67 = vector.multi_reduction <add>, %66, %cst_37 [2] : vector<4x8x8xf32> to vector<4x8xf32>
    %68 = vector.shape_cast %67 : vector<4x8xf32> to vector<4x8x1xf32>
    %69 = tpu.reciprocal %68 {approx = true} : vector<4x8x1xf32> -> vector<4x8x1xf32>
    %70 = vector.broadcast %69 : vector<4x8x1xf32> to vector<4x8x8xf32>
    %71 = arith.mulf %66, %70 : vector<4x8x8xf32>
    %72 = arith.truncf %71 : vector<4x8x8xf32> to vector<4x8x8xbf16>
    %73 = arith.truncf %55 : vector<4x8x8xf32> to vector<4x8x8xbf16>
    "tpu.trace_start"() <{level = 10 : i32, message = "hqk,hkf->hqf"}> : () -> ()
    %cst_38 = arith.constant dense<0.000000e+00> : vector<4x8x8xf32>
    %74 = tpu.matmul %72, %73, %cst_38 {dimension_numbers = #tpu.dot_dimension_numbers<[2], [1], [1], [2], [0, 0, 0, 1, 1, 2], [0], [0]>} : vector<4x8x8xbf16>, vector<4x8x8xbf16>, vector<4x8x8xf32> -> vector<4x8x8xf32>
    "tpu.trace_stop"() : () -> ()
    %75 = arith.truncf %74 : vector<4x8x8xf32> to vector<4x8x8xbf16>
    %c0_39 = arith.constant 0 : index
    %c0_40 = arith.constant 0 : index
    %c0_41 = arith.constant 0 : index
    %c0_42 = arith.constant 0 : index
    %76 = vector.load %arg6[%c0_39, %c0_40, %c0_41, %c0_42] : memref<2x4x8x32xbf16, #tpu.memory_space<vmem>>, vector<1x4x8x32xbf16>
    %77 = vector.shape_cast %76 : vector<1x4x8x32xbf16> to vector<4x8x32xbf16>
    "tpu.trace_start"() <{level = 10 : i32, message = "hnf,hfd->hnd"}> : () -> ()
    %cst_43 = arith.constant dense<0.000000e+00> : vector<4x8x32xf32>
    %78 = tpu.matmul %75, %77, %cst_43 {dimension_numbers = #tpu.dot_dimension_numbers<[2], [1], [1], [2], [0, 0, 0, 1, 1, 2], [0], [0]>} : vector<4x8x8xbf16>, vector<4x8x32xbf16>, vector<4x8x32xf32> -> vector<4x8x32xf32>
    "tpu.trace_stop"() : () -> ()
    %cst_44 = arith.constant dense<0.000000e+00> : vector<8x32xf32>
    %79 = vector.multi_reduction <add>, %78, %cst_44 [0] : vector<4x8x32xf32> to vector<8x32xf32>
    %80 = arith.addf %1, %79 : vector<8x32xf32>
    %81 = vector.broadcast %12 : vector<1x32xf32> to vector<8x32xf32>
    %82 = arith.addf %80, %81 : vector<8x32xf32>
    %cst_45 = arith.constant dense<0.000000e+00> : vector<8xf32>
    %83 = vector.multi_reduction <add>, %82, %cst_45 [1] : vector<8x32xf32> to vector<8xf32>
    %84 = vector.shape_cast %83 : vector<8xf32> to vector<8x1xf32>
    %cst_46 = arith.constant 3.200000e+01 : f32
    %85 = vector.broadcast %cst_46 : f32 to vector<8x1xf32>
    %86 = arith.divf %84, %85 : vector<8x1xf32>
    %87 = vector.broadcast %86 : vector<8x1xf32> to vector<8x32xf32>
    %88 = arith.subf %82, %87 : vector<8x32xf32>
    %89 = arith.mulf %88, %88 : vector<8x32xf32>
    %cst_47 = arith.constant dense<0.000000e+00> : vector<8xf32>
    %90 = vector.multi_reduction <add>, %89, %cst_47 [1] : vector<8x32xf32> to vector<8xf32>
    %91 = vector.shape_cast %90 : vector<8xf32> to vector<8x1xf32>
    %cst_48 = arith.constant 3.200000e+01 : f32
    %92 = vector.broadcast %cst_48 : f32 to vector<8x1xf32>
    %93 = arith.divf %91, %92 : vector<8x1xf32>
    %cst_49 = arith.constant 9.99999974E-6 : f32
    %94 = vector.broadcast %cst_49 : f32 to vector<8x1xf32>
    %95 = arith.addf %93, %94 : vector<8x1xf32>
    %96 = math.rsqrt %95 : vector<8x1xf32>
    %97 = vector.broadcast %96 : vector<8x1xf32> to vector<8x32xf32>
    %98 = arith.mulf %88, %97 : vector<8x32xf32>
    %99 = vector.broadcast %13 : vector<1x32xf32> to vector<8x32xf32>
    %100 = arith.mulf %98, %99 : vector<8x32xf32>
    %101 = vector.broadcast %14 : vector<1x32xf32> to vector<8x32xf32>
    %102 = arith.addf %100, %101 : vector<8x32xf32>
    %103 = arith.truncf %102 : vector<8x32xf32> to vector<8x32xbf16>
    %cst_50 = arith.constant dense<0.000000e+00> : vector<8x128xf32>
    %104 = tpu.matmul %103, %17, %cst_50 {dimension_numbers = #tpu.dot_dimension_numbers<[1], [0], [0], [1], [0, 0, 1, 1], [], []>} : vector<8x32xbf16>, vector<32x128xbf16>, vector<8x128xf32> -> vector<8x128xf32>
    %105 = vector.broadcast %16 : vector<1x128xf32> to vector<8x128xf32>
    %106 = arith.addf %104, %105 : vector<8x128xf32>
    %cst_51 = arith.constant 1.702000e+00 : f32
    %107 = vector.broadcast %cst_51 : f32 to vector<8x128xf32>
    %108 = arith.mulf %107, %106 : vector<8x128xf32>
    %109 = arith.negf %108 : vector<8x128xf32>
    %110 = math.exp %109 : vector<8x128xf32>
    %cst_52 = arith.constant 1.000000e+00 : f32
    %111 = vector.broadcast %cst_52 : f32 to vector<8x128xf32>
    %112 = arith.addf %111, %110 : vector<8x128xf32>
    %113 = arith.divf %111, %112 : vector<8x128xf32>
    %114 = arith.mulf %106, %113 : vector<8x128xf32>
    %115 = arith.truncf %114 : vector<8x128xf32> to vector<8x128xbf16>
    %cst_53 = arith.constant dense<0.000000e+00> : vector<8x32xf32>
    %116 = tpu.matmul %115, %18, %cst_53 {dimension_numbers = #tpu.dot_dimension_numbers<[1], [0], [0], [1], [0, 0, 1, 1], [], []>} : vector<8x128xbf16>, vector<128x32xbf16>, vector<8x32xf32> -> vector<8x32xf32>
    %117 = vector.broadcast %15 : vector<1x32xf32> to vector<8x32xf32>
    %118 = arith.addf %116, %117 : vector<8x32xf32>
    %119 = arith.addf %82, %118 : vector<8x32xf32>
    %c7 = arith.constant 7 : index
    %c0_54 = arith.constant 0 : index
    %120 = vector.load %arg3[%c7, %c0_54] : memref<16x128xf32, #tpu.memory_space<vmem>>, vector<1x32xf32>
    %c8 = arith.constant 8 : index
    %c0_55 = arith.constant 0 : index
    %121 = vector.load %arg3[%c8, %c0_55] : memref<16x128xf32, #tpu.memory_space<vmem>>, vector<1x32xf32>
    %c9 = arith.constant 9 : index
    %c0_56 = arith.constant 0 : index
    %122 = vector.load %arg3[%c9, %c0_56] : memref<16x128xf32, #tpu.memory_space<vmem>>, vector<1x32xf32>
    %c10 = arith.constant 10 : index
    %c0_57 = arith.constant 0 : index
    %123 = vector.load %arg3[%c10, %c0_57] : memref<16x128xf32, #tpu.memory_space<vmem>>, vector<1x32xf32>
    %c11 = arith.constant 11 : index
    %c0_58 = arith.constant 0 : index
    %124 = vector.load %arg3[%c11, %c0_58] : memref<16x128xf32, #tpu.memory_space<vmem>>, vector<1x32xf32>
    %c12 = arith.constant 12 : index
    %c0_59 = arith.constant 0 : index
    %125 = vector.load %arg3[%c12, %c0_59] : memref<16x128xf32, #tpu.memory_space<vmem>>, vector<1x32xf32>
    %c13 = arith.constant 13 : index
    %c0_60 = arith.constant 0 : index
    %126 = vector.load %arg3[%c13, %c0_60] : memref<16x128xf32, #tpu.memory_space<vmem>>, vector<1x128xf32>
    %c160 = arith.constant 160 : index
    %c0_61 = arith.constant 0 : index
    %127 = vector.load %arg7[%c160, %c0_61] : memref<352x128xbf16, #tpu.memory_space<vmem>>, vector<32x128xbf16>
    %c192 = arith.constant 192 : index
    %c0_62 = arith.constant 0 : index
    %128 = vector.load %arg7[%c192, %c0_62] : memref<352x128xbf16, #tpu.memory_space<vmem>>, vector<128x32xbf16>
    %c2_63 = arith.constant 2 : index
    %c0_64 = arith.constant 0 : index
    %c0_65 = arith.constant 0 : index
    %c0_66 = arith.constant 0 : index
    %129 = vector.load %arg4[%c2_63, %c0_64, %c0_65, %c0_66] : memref<4x4x1x8xf32, #tpu.memory_space<vmem>>, vector<1x4x1x8xf32>
    %130 = vector.shape_cast %129 : vector<1x4x1x8xf32> to vector<4x1x8xf32>
    %c3_67 = arith.constant 3 : index
    %c0_68 = arith.constant 0 : index
    %c0_69 = arith.constant 0 : index
    %c0_70 = arith.constant 0 : index
    %131 = vector.load %arg4[%c3_67, %c0_68, %c0_69, %c0_70] : memref<4x4x1x8xf32, #tpu.memory_space<vmem>>, vector<1x4x1x8xf32>
    %132 = vector.shape_cast %131 : vector<1x4x1x8xf32> to vector<4x1x8xf32>
    %cst_71 = arith.constant dense<0.000000e+00> : vector<8xf32>
    %133 = vector.multi_reduction <add>, %119, %cst_71 [1] : vector<8x32xf32> to vector<8xf32>
    %134 = vector.shape_cast %133 : vector<8xf32> to vector<8x1xf32>
    %cst_72 = arith.constant 3.200000e+01 : f32
    %135 = vector.broadcast %cst_72 : f32 to vector<8x1xf32>
    %136 = arith.divf %134, %135 : vector<8x1xf32>
    %137 = vector.broadcast %136 : vector<8x1xf32> to vector<8x32xf32>
    %138 = arith.subf %119, %137 : vector<8x32xf32>
    %139 = arith.mulf %138, %138 : vector<8x32xf32>
    %cst_73 = arith.constant dense<0.000000e+00> : vector<8xf32>
    %140 = vector.multi_reduction <add>, %139, %cst_73 [1] : vector<8x32xf32> to vector<8xf32>
    %141 = vector.shape_cast %140 : vector<8xf32> to vector<8x1xf32>
    %cst_74 = arith.constant 3.200000e+01 : f32
    %142 = vector.broadcast %cst_74 : f32 to vector<8x1xf32>
    %143 = arith.divf %141, %142 : vector<8x1xf32>
    %cst_75 = arith.constant 9.99999974E-6 : f32
    %144 = vector.broadcast %cst_75 : f32 to vector<8x1xf32>
    %145 = arith.addf %143, %144 : vector<8x1xf32>
    %146 = math.rsqrt %145 : vector<8x1xf32>
    %147 = vector.broadcast %146 : vector<8x1xf32> to vector<8x32xf32>
    %148 = arith.mulf %138, %147 : vector<8x32xf32>
    %149 = vector.broadcast %120 : vector<1x32xf32> to vector<8x32xf32>
    %150 = arith.mulf %148, %149 : vector<8x32xf32>
    %151 = vector.broadcast %121 : vector<1x32xf32> to vector<8x32xf32>
    %152 = arith.addf %150, %151 : vector<8x32xf32>
    %153 = arith.truncf %152 : vector<8x32xf32> to vector<8x32xbf16>
    %154 = vector.shape_cast %153 : vector<8x32xbf16> to vector<1x8x32xbf16>
    %155 = vector.broadcast %154 : vector<1x8x32xbf16> to vector<4x8x32xbf16>
    %c1_76 = arith.constant 1 : index
    %c0_77 = arith.constant 0 : index
    %c0_78 = arith.constant 0 : index
    %c0_79 = arith.constant 0 : index
    %156 = vector.load %arg5[%c1_76, %c0_77, %c0_78, %c0_79] : memref<2x4x32x24xbf16, #tpu.memory_space<vmem>>, vector<1x4x32x24xbf16>
    %157 = vector.shape_cast %156 : vector<1x4x32x24xbf16> to vector<4x32x24xbf16>
    "tpu.trace_start"() <{level = 10 : i32, message = "hnd,hdf->hnf"}> : () -> ()
    %cst_80 = arith.constant dense<0.000000e+00> : vector<4x8x24xf32>
    %158 = tpu.matmul %155, %157, %cst_80 {dimension_numbers = #tpu.dot_dimension_numbers<[2], [1], [1], [2], [0, 0, 0, 1, 1, 2], [0], [0]>} : vector<4x8x32xbf16>, vector<4x32x24xbf16>, vector<4x8x24xf32> -> vector<4x8x24xf32>
    "tpu.trace_stop"() : () -> ()
    %159 = vector.extract_strided_slice %158 {offsets = [0, 0, 0], sizes = [4, 8, 8], strides = [1, 1, 1]} : vector<4x8x24xf32> to vector<4x8x8xf32>
    %160 = vector.broadcast %130 : vector<4x1x8xf32> to vector<4x8x8xf32>
    %161 = arith.addf %159, %160 : vector<4x8x8xf32>
    %162 = vector.extract_strided_slice %158 {offsets = [0, 0, 8], sizes = [4, 8, 8], strides = [1, 1, 1]} : vector<4x8x24xf32> to vector<4x8x8xf32>
    %163 = vector.extract_strided_slice %158 {offsets = [0, 0, 16], sizes = [4, 8, 8], strides = [1, 1, 1]} : vector<4x8x24xf32> to vector<4x8x8xf32>
    %164 = vector.broadcast %132 : vector<4x1x8xf32> to vector<4x8x8xf32>
    %165 = arith.addf %163, %164 : vector<4x8x8xf32>
    %166 = arith.truncf %161 : vector<4x8x8xf32> to vector<4x8x8xbf16>
    %167 = arith.truncf %162 : vector<4x8x8xf32> to vector<4x8x8xbf16>
    "tpu.trace_start"() <{level = 10 : i32, message = "hqf,hkf->hqk"}> : () -> ()
    %cst_81 = arith.constant dense<0.000000e+00> : vector<4x8x8xf32>
    %168 = tpu.matmul %166, %167, %cst_81 {dimension_numbers = #tpu.dot_dimension_numbers<[2], [2], [1], [1], [0, 0, 0, 1, 1, 1], [0], [0]>} : vector<4x8x8xbf16>, vector<4x8x8xbf16>, vector<4x8x8xf32> -> vector<4x8x8xf32>
    "tpu.trace_stop"() : () -> ()
    %169 = vector.shape_cast %9 : vector<8x8xf32> to vector<1x8x8xf32>
    %170 = vector.broadcast %169 : vector<1x8x8xf32> to vector<4x8x8xf32>
    %171 = arith.addf %168, %170 : vector<4x8x8xf32>
    %cst_82 = arith.constant dense<0xFF800000> : vector<4x8xf32>
    %172 = vector.multi_reduction <maximumf>, %171, %cst_82 [2] : vector<4x8x8xf32> to vector<4x8xf32>
    %173 = vector.shape_cast %172 : vector<4x8xf32> to vector<4x8x1xf32>
    %174 = vector.broadcast %173 : vector<4x8x1xf32> to vector<4x8x8xf32>
    %175 = arith.subf %171, %174 : vector<4x8x8xf32>
    %176 = math.exp %175 : vector<4x8x8xf32>
    %cst_83 = arith.constant dense<0.000000e+00> : vector<4x8xf32>
    %177 = vector.multi_reduction <add>, %176, %cst_83 [2] : vector<4x8x8xf32> to vector<4x8xf32>
    %178 = vector.shape_cast %177 : vector<4x8xf32> to vector<4x8x1xf32>
    %179 = tpu.reciprocal %178 {approx = true} : vector<4x8x1xf32> -> vector<4x8x1xf32>
    %180 = vector.broadcast %179 : vector<4x8x1xf32> to vector<4x8x8xf32>
    %181 = arith.mulf %176, %180 : vector<4x8x8xf32>
    %182 = arith.truncf %181 : vector<4x8x8xf32> to vector<4x8x8xbf16>
    %183 = arith.truncf %165 : vector<4x8x8xf32> to vector<4x8x8xbf16>
    "tpu.trace_start"() <{level = 10 : i32, message = "hqk,hkf->hqf"}> : () -> ()
    %cst_84 = arith.constant dense<0.000000e+00> : vector<4x8x8xf32>
    %184 = tpu.matmul %182, %183, %cst_84 {dimension_numbers = #tpu.dot_dimension_numbers<[2], [1], [1], [2], [0, 0, 0, 1, 1, 2], [0], [0]>} : vector<4x8x8xbf16>, vector<4x8x8xbf16>, vector<4x8x8xf32> -> vector<4x8x8xf32>
    "tpu.trace_stop"() : () -> ()
    %185 = arith.truncf %184 : vector<4x8x8xf32> to vector<4x8x8xbf16>
    %c1_85 = arith.constant 1 : index
    %c0_86 = arith.constant 0 : index
    %c0_87 = arith.constant 0 : index
    %c0_88 = arith.constant 0 : index
    %186 = vector.load %arg6[%c1_85, %c0_86, %c0_87, %c0_88] : memref<2x4x8x32xbf16, #tpu.memory_space<vmem>>, vector<1x4x8x32xbf16>
    %187 = vector.shape_cast %186 : vector<1x4x8x32xbf16> to vector<4x8x32xbf16>
    "tpu.trace_start"() <{level = 10 : i32, message = "hnf,hfd->hnd"}> : () -> ()
    %cst_89 = arith.constant dense<0.000000e+00> : vector<4x8x32xf32>
    %188 = tpu.matmul %185, %187, %cst_89 {dimension_numbers = #tpu.dot_dimension_numbers<[2], [1], [1], [2], [0, 0, 0, 1, 1, 2], [0], [0]>} : vector<4x8x8xbf16>, vector<4x8x32xbf16>, vector<4x8x32xf32> -> vector<4x8x32xf32>
    "tpu.trace_stop"() : () -> ()
    %cst_90 = arith.constant dense<0.000000e+00> : vector<8x32xf32>
    %189 = vector.multi_reduction <add>, %188, %cst_90 [0] : vector<4x8x32xf32> to vector<8x32xf32>
    %190 = arith.addf %119, %189 : vector<8x32xf32>
    %191 = vector.broadcast %122 : vector<1x32xf32> to vector<8x32xf32>
    %192 = arith.addf %190, %191 : vector<8x32xf32>
    %cst_91 = arith.constant dense<0.000000e+00> : vector<8xf32>
    %193 = vector.multi_reduction <add>, %192, %cst_91 [1] : vector<8x32xf32> to vector<8xf32>
    %194 = vector.shape_cast %193 : vector<8xf32> to vector<8x1xf32>
    %cst_92 = arith.constant 3.200000e+01 : f32
    %195 = vector.broadcast %cst_92 : f32 to vector<8x1xf32>
    %196 = arith.divf %194, %195 : vector<8x1xf32>
    %197 = vector.broadcast %196 : vector<8x1xf32> to vector<8x32xf32>
    %198 = arith.subf %192, %197 : vector<8x32xf32>
    %199 = arith.mulf %198, %198 : vector<8x32xf32>
    %cst_93 = arith.constant dense<0.000000e+00> : vector<8xf32>
    %200 = vector.multi_reduction <add>, %199, %cst_93 [1] : vector<8x32xf32> to vector<8xf32>
    %201 = vector.shape_cast %200 : vector<8xf32> to vector<8x1xf32>
    %cst_94 = arith.constant 3.200000e+01 : f32
    %202 = vector.broadcast %cst_94 : f32 to vector<8x1xf32>
    %203 = arith.divf %201, %202 : vector<8x1xf32>
    %cst_95 = arith.constant 9.99999974E-6 : f32
    %204 = vector.broadcast %cst_95 : f32 to vector<8x1xf32>
    %205 = arith.addf %203, %204 : vector<8x1xf32>
    %206 = math.rsqrt %205 : vector<8x1xf32>
    %207 = vector.broadcast %206 : vector<8x1xf32> to vector<8x32xf32>
    %208 = arith.mulf %198, %207 : vector<8x32xf32>
    %209 = vector.broadcast %123 : vector<1x32xf32> to vector<8x32xf32>
    %210 = arith.mulf %208, %209 : vector<8x32xf32>
    %211 = vector.broadcast %124 : vector<1x32xf32> to vector<8x32xf32>
    %212 = arith.addf %210, %211 : vector<8x32xf32>
    %213 = arith.truncf %212 : vector<8x32xf32> to vector<8x32xbf16>
    %cst_96 = arith.constant dense<0.000000e+00> : vector<8x128xf32>
    %214 = tpu.matmul %213, %127, %cst_96 {dimension_numbers = #tpu.dot_dimension_numbers<[1], [0], [0], [1], [0, 0, 1, 1], [], []>} : vector<8x32xbf16>, vector<32x128xbf16>, vector<8x128xf32> -> vector<8x128xf32>
    %215 = vector.broadcast %126 : vector<1x128xf32> to vector<8x128xf32>
    %216 = arith.addf %214, %215 : vector<8x128xf32>
    %cst_97 = arith.constant 1.702000e+00 : f32
    %217 = vector.broadcast %cst_97 : f32 to vector<8x128xf32>
    %218 = arith.mulf %217, %216 : vector<8x128xf32>
    %219 = arith.negf %218 : vector<8x128xf32>
    %220 = math.exp %219 : vector<8x128xf32>
    %cst_98 = arith.constant 1.000000e+00 : f32
    %221 = vector.broadcast %cst_98 : f32 to vector<8x128xf32>
    %222 = arith.addf %221, %220 : vector<8x128xf32>
    %223 = arith.divf %221, %222 : vector<8x128xf32>
    %224 = arith.mulf %216, %223 : vector<8x128xf32>
    %225 = arith.truncf %224 : vector<8x128xf32> to vector<8x128xbf16>
    %cst_99 = arith.constant dense<0.000000e+00> : vector<8x32xf32>
    %226 = tpu.matmul %225, %128, %cst_99 {dimension_numbers = #tpu.dot_dimension_numbers<[1], [0], [0], [1], [0, 0, 1, 1], [], []>} : vector<8x128xbf16>, vector<128x32xbf16>, vector<8x32xf32> -> vector<8x32xf32>
    %227 = vector.broadcast %125 : vector<1x32xf32> to vector<8x32xf32>
    %228 = arith.addf %226, %227 : vector<8x32xf32>
    %229 = arith.addf %192, %228 : vector<8x32xf32>
    %c14 = arith.constant 14 : index
    %c0_100 = arith.constant 0 : index
    %230 = vector.load %arg3[%c14, %c0_100] : memref<16x128xf32, #tpu.memory_space<vmem>>, vector<1x32xf32>
    %c15 = arith.constant 15 : index
    %c0_101 = arith.constant 0 : index
    %231 = vector.load %arg3[%c15, %c0_101] : memref<16x128xf32, #tpu.memory_space<vmem>>, vector<1x32xf32>
    %cst_102 = arith.constant dense<0.000000e+00> : vector<8xf32>
    %232 = vector.multi_reduction <add>, %229, %cst_102 [1] : vector<8x32xf32> to vector<8xf32>
    %233 = vector.shape_cast %232 : vector<8xf32> to vector<8x1xf32>
    %cst_103 = arith.constant 3.200000e+01 : f32
    %234 = vector.broadcast %cst_103 : f32 to vector<8x1xf32>
    %235 = arith.divf %233, %234 : vector<8x1xf32>
    %236 = vector.broadcast %235 : vector<8x1xf32> to vector<8x32xf32>
    %237 = arith.subf %229, %236 : vector<8x32xf32>
    %238 = arith.mulf %237, %237 : vector<8x32xf32>
    %cst_104 = arith.constant dense<0.000000e+00> : vector<8xf32>
    %239 = vector.multi_reduction <add>, %238, %cst_104 [1] : vector<8x32xf32> to vector<8xf32>
    %240 = vector.shape_cast %239 : vector<8xf32> to vector<8x1xf32>
    %cst_105 = arith.constant 3.200000e+01 : f32
    %241 = vector.broadcast %cst_105 : f32 to vector<8x1xf32>
    %242 = arith.divf %240, %241 : vector<8x1xf32>
    %cst_106 = arith.constant 9.99999974E-6 : f32
    %243 = vector.broadcast %cst_106 : f32 to vector<8x1xf32>
    %244 = arith.addf %242, %243 : vector<8x1xf32>
    %245 = math.rsqrt %244 : vector<8x1xf32>
    %246 = vector.broadcast %245 : vector<8x1xf32> to vector<8x32xf32>
    %247 = arith.mulf %237, %246 : vector<8x32xf32>
    %248 = vector.broadcast %230 : vector<1x32xf32> to vector<8x32xf32>
    %249 = arith.mulf %247, %248 : vector<8x32xf32>
    %250 = vector.broadcast %231 : vector<1x32xf32> to vector<8x32xf32>
    %251 = arith.addf %249, %250 : vector<8x32xf32>
    %252 = vector.broadcast %3 : vector<8x1xf32> to vector<8x32xf32>
    %253 = arith.mulf %251, %252 : vector<8x32xf32>
    %cst_107 = arith.constant dense<0.000000e+00> : vector<32xf32>
    %254 = vector.multi_reduction <add>, %253, %cst_107 [0] : vector<8x32xf32> to vector<32xf32>
    %255 = vector.shape_cast %254 : vector<32xf32> to vector<1x32xf32>
    %c320 = arith.constant 320 : index
    %c0_108 = arith.constant 0 : index
    %256 = vector.load %arg7[%c320, %c0_108] : memref<352x128xbf16, #tpu.memory_space<vmem>>, vector<32x32xbf16>
    %257 = arith.truncf %255 : vector<1x32xf32> to vector<1x32xbf16>
    %cst_109 = arith.constant dense<0.000000e+00> : vector<1x32xf32>
    %258 = tpu.matmul %257, %256, %cst_109 {dimension_numbers = #tpu.dot_dimension_numbers<[1], [0], [0], [1], [0, 0, 1, 1], [], []>} : vector<1x32xbf16>, vector<32x32xbf16>, vector<1x32xf32> -> vector<1x32xf32>
    %c0_110 = arith.constant 0 : index
    %c0_111 = arith.constant 0 : index
    %c0_112 = arith.constant 0 : index
    %259 = vector.load %arg8[%c0_110, %c0_111, %c0_112] : memref<1x1x32xf32, #tpu.memory_space<vmem>>, vector<1x1x32xf32>
    %260 = vector.shape_cast %259 : vector<1x1x32xf32> to vector<1x32xf32>
    %261 = vector.shape_cast %258 : vector<1x32xf32> to vector<1x1x32xf32>
    tpu.vector_store %arg8[%c0_110, %c0_111, %c0_112], %261 {strides = array<i32>} : memref<1x1x32xf32, #tpu.memory_space<vmem>>, vector<1x1x32xf32>,
    return
  }
  func.func @transform_0(%arg0: i32) -> (i32, i32, i32) {
    %c0_i32 = arith.constant 0 : i32
    %c0_i32_0 = arith.constant 0 : i32
    %c0_i32_1 = arith.constant 0 : i32
    return %arg0, %c0_i32, %c0_i32_0 : i32, i32, i32
  }
  func.func @transform_1(%arg0: i32) -> (i32, i32, i32) {
    %c0_i32 = arith.constant 0 : i32
    %c0_i32_0 = arith.constant 0 : i32
    %c0_i32_1 = arith.constant 0 : i32
    return %arg0, %c0_i32, %c0_i32_0 : i32, i32, i32
  }
  func.func @transform_2(%arg0: i32) -> (i32, i32) {
    %c0_i32 = arith.constant 0 : i32
    %c0_i32_0 = arith.constant 0 : i32
    %c0_i32_1 = arith.constant 0 : i32
    return %c0_i32, %c0_i32_0 : i32, i32
  }
  func.func @transform_3(%arg0: i32) -> (i32, i32, i32, i32) {
    %c0_i32 = arith.constant 0 : i32
    %c0_i32_0 = arith.constant 0 : i32
    %c0_i32_1 = arith.constant 0 : i32
    %c0_i32_2 = arith.constant 0 : i32
    %c0_i32_3 = arith.constant 0 : i32
    return %c0_i32, %c0_i32_0, %c0_i32_1, %c0_i32_2 : i32, i32, i32, i32
  }
  func.func @transform_4(%arg0: i32) -> (i32, i32, i32, i32) {
    %c0_i32 = arith.constant 0 : i32
    %c0_i32_0 = arith.constant 0 : i32
    %c0_i32_1 = arith.constant 0 : i32
    %c0_i32_2 = arith.constant 0 : i32
    %c0_i32_3 = arith.constant 0 : i32
    return %c0_i32, %c0_i32_0, %c0_i32_1, %c0_i32_2 : i32, i32, i32, i32
  }
  func.func @transform_5(%arg0: i32) -> (i32, i32, i32, i32) {
    %c0_i32 = arith.constant 0 : i32
    %c0_i32_0 = arith.constant 0 : i32
    %c0_i32_1 = arith.constant 0 : i32
    %c0_i32_2 = arith.constant 0 : i32
    %c0_i32_3 = arith.constant 0 : i32
    return %c0_i32, %c0_i32_0, %c0_i32_1, %c0_i32_2 : i32, i32, i32, i32
  }
  func.func @transform_6(%arg0: i32) -> (i32, i32) {
    %c0_i32 = arith.constant 0 : i32
    %c0_i32_0 = arith.constant 0 : i32
    %c0_i32_1 = arith.constant 0 : i32
    return %c0_i32, %c0_i32_0 : i32, i32
  }
  func.func @transform_7(%arg0: i32) -> (i32, i32, i32) {
    %c0_i32 = arith.constant 0 : i32
    %c0_i32_0 = arith.constant 0 : i32
    %c0_i32_1 = arith.constant 0 : i32
    return %arg0, %c0_i32, %c0_i32_0 : i32, i32, i32
  }
}

</mosaic_0001>

<bundles_post_ra>
// kernel: clip_text_encoder_forward.1
= control target key start
LH: loop header
LB: loop body
LE: loop exit
PB: predicated region body
PF: predicated region fallthrough
CT: control target
= control target key end

     0   :  { %12 = vsyncpa [#allocation3], 0  ;;  %s4314_s0 = inlined_call_operand.vmem [shape: f32[2,8,32], index: 0, kind: input, shape index: {}]   ;;  %s4315_s1 = inlined_call_operand.vmem [shape: f32[2,8,1], index: 1, kind: input, shape index: {}]   ;;  %s4316_s2 = inlined_call_operand.vmem [shape: f32[16,128], index: 2, kind: input, shape index: {}]   ;;  %s4317_s3 = inlined_call_operand.vmem [shape: f32[4,4,1,8], index: 3, kind: input, shape index: {}]   ;;  %s4318_s4 = inlined_call_operand.vmem [shape: bf16[2,4,32,24], index: 4, kind: input, shape index: {}]   ;;  %s4319_s5 = inlined_call_operand.vmem [shape: bf16[2,4,8,32], index: 5, kind: input, shape index: {}]   ;;  %s4320_s6 = inlined_call_operand.vmem [shape: bf16[352,128], index: 6, kind: input, shape index: {}]   ;;  %s4321_s7 = inlined_call_operand.hbm [shape: f32[2,1,32], index: 7, kind: output, shape index: {}]  }
   0x1   :  { %14 = vsyncpa [#allocation3 + $0x1], 0  ;;  %s3638_s24 = smov 0   ;;  %s3640_s25 = smov 0  }
   0x2   :  { %s3642_s26 = smov 0   ;;  %s3644_s27 = smov 0  }
   0x3 LB: > { %s3659_s28 = sadd.s32 4294967295, %s3588_s27   ;;  %s2872_s29 = sadd.s32 4294967294, %s3588_s27   ;;  %s3588_s27 = sphi %s3644_s27, %s4327_s27   ;;  %s3584_s26 = sphi %s3642_s26, %s4326_s26   ;;  %s3580_s25 = sphi %s3640_s25, %s4325_s25   ;;  %s3576_s24 = sphi %s3638_s24, %s4324_s24  }
   0x4   : > { %s3663_s30 = sadd.s32 1, %s3588_s27   ;;  %s184_s8 = sadd.s32 1, %s3584_s26 }
   0x5   : > { %s181_s9 = ssub.s32 %s3588_s27, %s3663_s30  ;;  %p194_p0 = scmp.ne.s32.totalorder %s3584_s26, %s3580_s25 }
   0x6   : > { %p182_p1 = scmp.eq.s32.totalorder %s181_s9, 0  ;;  %p195_p2 = scmp.eq.s32.totalorder %s3659_s28, 1 }
   0x7   : > { %p200_p3 = scmp.ne.s32.totalorder %s3580_s25, %s3576_s24  ;;  %p201_p4 = scmp.eq.s32.totalorder %s2872_s29, 1 }
   0x8   : > { %s3674_s10 = scalar_select %p182_p1, %s3584_s26, %s184_s8  }
   0x9   : > { %p3676_p5 = por %p195_p2, %p194_p0  ;;  %p3680_p6 = por %p201_p4, %p200_p3 }
   0xa   : > { %p2875_p7 = scmp.ge.s32.totalorder %s3588_s27, 1  ;;  %p248_p8 = scmp.lt.s32.totalorder %s3588_s27, 3 }
   0xc   : > { %p249_p9 = pnand %p2875_p7, %p248_p8 }
   0xd   : > { %p282_p10 = scmp.lt.s32.totalorder (!%p249_p9), %s3659_s28, 1  ;;  %vm335_vm0 = vcmask (!%p249_p9), 261120   ;;  %v3438_v7 = vld [vmem:[%s4318_s4] sm:$0xff] (!%p249_p9)   ;;  %v3590_v9 = vmov (!%p249_p9), 0.0   ;;  %v3440_v10 = vld [vmem:[%s4318_s4 + $0x8] sm:$0xff] (!%p249_p9)   ;;  %vm3591_vm1 = vmmov (!%p249_p9), 0  }
   0xe   : > { %252 = sbr.rel (%p249_p9) target bundleno = 5476 (0x1564), region = 48  ;;  %v3439_v8 = vld [vmem:[%s4318_s4 + $0x20] sm:$0xff] (!%p249_p9)   ;;  %3119 = vmatprep.subr.bf16.mxu1 (!%p249_p9), %v3590_v9  ;;  %3135 = vmatprep.subr.bf16.mxu0 (!%p249_p9), %v3590_v9  ;;  %v3441_v11 = vld [vmem:[%s4318_s4 + $0x28] sm:$0xff] (!%p249_p9)   ;;  %v3442_v21 = vld [vmem:[%s4318_s4 + $0x10] sm:$0xff] (!%p249_p9)   ;;  %s3592_s9 = smov (!%p249_p9), 120   ;;  %vm663_vm2 = vcmask (!%p249_p9), 64512  }
   0xf   : > { %3120 = vmatpush3.bf16.msra.mxu1 (!%p249_p9), %v3438_v7  ;;  %3136 = vmatpush3.bf16.msra.mxu0 (!%p249_p9), %v3439_v8  ;;  %v2882_v16 = vld [vmem:[%s4316_s2] ss:$0 sm:$0xff] (!%p249_p9)  ;;  %v2883_v18 = vld [vmem:[%s4316_s2 + $0x1] ss:$0 sm:$0xff] (!%p249_p9)  ;;  %v3443_v23 = vld [vmem:[%s4318_s4 + $0x18] sm:$0xff] (!%p249_p9)   ;;  %s3594_s8 = smov (!%p249_p9), 16  }
  0x10   : > { %3121 = vmatprep.subr.bf16.mxu1 (!%p249_p9), %v3590_v9  ;;  %3137 = vmatprep.subr.bf16.mxu0 (!%p249_p9), %v3590_v9  ;;  %v3444_v24 = vld [vmem:[%s4318_s4 + $0x30] sm:$0xff] (!%p249_p9)   ;;  %v3445_v25 = vld [vmem:[%s4318_s4 + $0x38] sm:$0xff] (!%p249_p9)   ;;  %v2896_v46 = vld [vmem:[%s4317_s3] ss:$0 sm:$0xff] (!%p249_p9)  ;;  %s3595_s21 = smov (!%p249_p9), 112   ;;  %vm915_vm4 = vcmask (!%p249_p9), 1043456  }
  0x11   : > { %3123 = vmatprep.mubr.msk.bf16.mxu1 (!%p249_p9), %vm3591_vm1, %v3590_v9  ;;  %3139 = vmatprep.mubr.msk.bf16.mxu0 (!%p249_p9), %vm3591_vm1, %v3590_v9  ;;  %v2898_v52 = vld [vmem:[%s4317_s3 + $0x2] ss:$0 sm:$0xff] (!%p249_p9)  ;;  %v2897_v53 = vld [vmem:[%s4317_s3 + $0x1] ss:$0 sm:$0xff] (!%p249_p9)  ;;  %v2899_v61 = vld [vmem:[%s4317_s3 + $0x3] ss:$0 sm:$0xff] (!%p249_p9) }
  0x12   : > { %s280_s20 = sand.u32 (!%p249_p9), 1, %s3580_s25   ;;  %vm2790_vm5 = vcmask (!%p249_p9), 253952  }
  0x13   : > { %3122 = vmatpush3.bf16.msra.mxu1 (!%p249_p9), %v3440_v10  ;;  %3138 = vmatpush3.bf16.msra.mxu0 (!%p249_p9), %v3441_v11  ;;  %s2793_s16 = scalar_lea.sflag (!%p249_p9), [#allocation3], %s280_s20 }
  0x14   : > { %3127 = vmatprep.subr.bf16.mxu1 (!%p249_p9), %v3590_v9  ;;  %3151 = vmatprep.subr.bf16.mxu0 (!%p249_p9), %v3590_v9 }
  0x15   : > { %s3688_s13 = scalar_select %p282_p10, %s3659_s28, 1 }
  0x17   : > { %s2876_s14 = sshll.u32 %s3688_s13, 3 }
  0x18   : > { %s285_s17 = scalar_lea.vmem %s4314_s0, %s2876_s14  ;;  %s289_s29 = scalar_lea.vmem %s4315_s1, %s2876_s14 }
  0x19   : > { %v3696_v0 = vld [vmem:[%s285_s17] sm:$0xff] }
  0x1a   : > { %v336_v1 = vsel %vm335_vm0, %v3696_v0, 0.0 }
  0x1b   : > { %337 = vadd.xlane.f32.xlu0 %v336_v1 }
  0xa8   : > { %v338_v2 = vpop.xlane.xlu0 %337 }
  0xa9   : > { %v340_v3 = vmul.f32 0.03125, %v338_v2 }
  0xab   : > { %v341_v4 = vsub.f32 %v3696_v0, %v340_v3  ;;  %v293_v3 = vlaneseq }
  0xad   : > { %v342_v5 = vmul.f32 %v341_v4, %v341_v4 }
  0xaf   : > { %v343_v6 = vsel %vm335_vm0, %v342_v5, 0.0  ;;  %v296_v5 = vand.u32 127, %v293_v3 }
  0xb0   : > { %344 = vadd.xlane.f32.xlu0 %v343_v6  ;;  %v3593_v6 = vmov -1e+09  }
 0x13d   : > { %v345_v12 = vpop.xlane.xlu0 %344 }
 0x13e   : > { %v346_v13 = vmul.f32 0.03125, %v345_v12 }
 0x140   : > { %v347_v14 = vadd.f32 1e-05, %v346_v13 }
 0x142   : > { %3476 = vrsqrt.f32 %v347_v14 }
 0x14c   : > { %v3477_v15 = vpop.eup %3476 }
 0x14d   : > { %v349_v17 = vmul.f32 %v3477_v15, %v341_v4  ;;  %v294_v4 = vshrl.u32 %v293_v3, 7 }
 0x14f   : > { %v354_v19 = vmul.f32 %v2882_v16, %v349_v17  ;;  %vm297_vm3 = vcmp.le.s32.totalorder %v296_v5, %v294_v4 }
 0x150   : > { %v3814_v7 = vsel %vm297_vm3, 0.0, %v3593_v6 }
 0x151   : > { %v359_v20 = vadd.f32 %v2883_v18, %v354_v19 }
 0x153   : > { %v360_v22 = vpack.c.bf16 %v359_v20, %v359_v20 }
 0x155   : > { %3124 = vmatmul.mubr.msk.bf16.vlgmr.msra.gmra.mrb[0].mxu1 %vm335_vm0, %v360_v22  ;;  %3140 = vmatmul.mubr.msk.bf16.vlgmr.msra.gmra.mrb[0].mxu0 %vm335_vm0, %v360_v22 }
 0x156   : > { %3128 = vmatpush3.bf16.msra.mxu1 %v3442_v21  ;;  %3131 = vmatprep.mubr.msk.bf16.mxu1 %vm3591_vm1, %v3590_v9 }
 0x157   : > { %3129 = vmatprep.subr.bf16.mxu1 %v3590_v9  ;;  %3153 = vmatprep.mubr.msk.bf16.mxu0 %vm3591_vm1, %v3590_v9 }
 0x15a   : > { %3130 = vmatpush3.bf16.msra.mxu1 %v3443_v23 }
 0x15b   : > { %3143 = vmatprep.subr.bf16.mxu1 %v3590_v9 }
 0x15d   : > { %3132 = vmatmul.mubr.msk.bf16.vlgmr.msra.gmra.mrb[4].mxu1 %vm335_vm0, %v360_v22 }
 0x15e   : > { %3144 = vmatpush3.bf16.msra.mxu1 %v3444_v24  ;;  %3147 = vmatprep.mubr.msk.bf16.mxu1 %vm3591_vm1, %v3590_v9 }
 0x15f   : > { %3145 = vmatprep.subr.bf16.mxu1 %v3590_v9 }
 0x162   : > { %3146 = vmatpush3.bf16.msra.mxu1 %v3445_v25 }
 0x163   : > { %3157 = vmatprep.subr.bf16.mxu1 %v3590_v9 }
 0x165   : > { %3148 = vmatmul.mubr.msk.bf16.vlgmr.msra.gmra.mrb[8].mxu1 %vm335_vm0, %v360_v22 }
 0x166   : > { %3159 = vmatprep.mubr.msk.bf16.mxu1 %vm3591_vm1, %v3590_v9 }
 0x228   : > { %v3758_v26 = vpop.f32.mrb[0].mxu1  ;;  %v3760_v27 = vpop.f32.mrb[0].mxu0 }
 0x229   : > { %v658_v28 = vpack.c.bf16 %v3760_v27, %v3760_v27  ;;  %v3125_v29 = vpop.f32.mrb[1].mxu1  ;;  %v3141_v30 = vpop.f32.mrb[1].mxu0  ;;  %v656_v31 = vpack.c.bf16 %v3758_v26, %v3758_v26  ;;  %v612_v49 = vadd.f32 %v2896_v46, %v3758_v26  ;;  %v614_v57 = vadd.f32 %v2898_v52, %v3760_v27 }
 0x22a   : > { %v429_v32 = vpop.f32.mrb[2].mxu1  ;;  %v533_v33 = vpop.f32.mrb[2].mxu0 }
 0x22b   : > { %760 = vrot.lane.b32.xlu0 %v658_v28, %s3592_s9  ;;  %v3142_v34 = vpop.f32.mrb[3].mxu0  ;;  %661 = vrot.lane.b32.xlu1 %v656_v31, %s3592_s9  ;;  %v3126_v35 = vpop.f32.mrb[3].mxu1  ;;  %v652_v51 = vpack.c.bf16 %v612_v49, %v612_v49  ;;  %v654_v59 = vpack.c.bf16 %v614_v57, %v614_v57 }
 0x22c   : > { %v2901_v35 = vld [vmem:[%s4317_s3 + $0x5] ss:$0 sm:$0xff] }
 0x230   : > { %v3768_v36 = vpop.f32.mrb[4].mxu1 }
 0x231   : > { %v657_v37 = vpack.c.bf16 %v3768_v36, %v3768_v36  ;;  %v3133_v38 = vpop.f32.mrb[5].mxu1  ;;  %v613_v58 = vadd.f32 %v2897_v53, %v3768_v36 }
 0x232   : > { %v481_v39 = vpop.f32.mrb[6].mxu1  ;;  %v2902_v38 = vld [vmem:[%s4317_s3 + $0x6] ss:$0 sm:$0xff] }
 0x233   : > { %711 = vrot.lane.b32.xlu1 %v657_v37, %s3592_s9  ;;  %v3134_v40 = vpop.f32.mrb[7].mxu1  ;;  %v653_v60 = vpack.c.bf16 %v613_v58, %v613_v58  ;;  %v2900_v37 = vld [vmem:[%s4317_s3 + $0x4] ss:$0 sm:$0xff]  ;;  %v2903_v39 = vld [vmem:[%s4317_s3 + $0x7] ss:$0 sm:$0xff] }
 0x238   : > { %v3773_v41 = vpop.f32.mrb[8].mxu1 }
 0x239   : > { %v659_v42 = vpack.c.bf16 %v3773_v41, %v3773_v41  ;;  %v3149_v43 = vpop.f32.mrb[9].mxu1  ;;  %v615_v1 = vadd.f32 %v2899_v61, %v3773_v41 }
 0x23a   : > { %v585_v44 = vpop.f32.mrb[10].mxu1 }
 0x23b   : > { %809 = vrot.lane.b32.xlu1 %v659_v42, %s3592_s9  ;;  %v3150_v45 = vpop.f32.mrb[11].mxu1  ;;  %v655_v2 = vpack.c.bf16 %v615_v1, %v615_v1 }
 0x29d   : > { %v662_v47 = vpop.permute.xlu1 %661  ;;  %v761_v50 = vpop.permute.xlu0 %760 }
 0x29e   : > { %v668_v48 = vsel %vm663_vm2, %v662_v47, 0  ;;  %v766_v55 = vsel %vm663_vm2, %v761_v50, 0 }
 0x29f   : > { %3152 = vmatpush3.bf16.xpose.msra.mxu0 %v668_v48 }
 0x2a0   : > { %3163 = vmatprep.subr.bf16.mxu0 %v3590_v9 }
 0x2a5   : > { %v712_v54 = vpop.permute.xlu1 %711 }
 0x2a6   : > { %v717_v56 = vsel %vm663_vm2, %v712_v54, 0  ;;  %3154 = vmatmul.mubr.msk.bf16.vlgmr.msra.gmra.mrb[4].mxu0 %vm663_vm2, %v652_v51 }
 0x2a7   : > { %3158 = vmatpush3.bf16.xpose.msra.mxu1 %v717_v56  ;;  %3164 = vmatpush3.bf16.xpose.msra.mxu0 %v766_v55 }
 0x2a8   : > { %3165 = vmatprep.mubr.msk.bf16.mxu0 %vm3591_vm1, %v3590_v9  ;;  %3169 = vmatprep.subr.bf16.mxu1 %v3590_v9 }
 0x2a9   : > { %3175 = vmatprep.subr.bf16.mxu0 %v3590_v9 }
 0x2ad   : > { %v810_v62 = vpop.permute.xlu1 %809 }
 0x2ae   : > { %v815_v63 = vsel %vm663_vm2, %v810_v62, 0  ;;  %3160 = vmatmul.mubr.msk.bf16.vlgmr.msra.gmra.mrb[12].mxu1 %vm663_vm2, %v653_v60  ;;  %3166 = vmatmul.mubr.msk.bf16.vlgmr.msra.gmra.mrb[8].mxu0 %vm663_vm2, %v654_v59 }
 0x2af   : > { %3170 = vmatpush3.bf16.xpose.msra.mxu1 %v815_v63  ;;  %3171 = vmatprep.mubr.msk.bf16.mxu1 %vm3591_vm1, %v3590_v9 }
 0x2b0   : > { %3181 = vmatprep.subr.bf16.mxu1 %v3590_v9  ;;  %3177 = vmatprep.mubr.msk.bf16.mxu0 %vm3591_vm1, %v3590_v9 }
 0x2b6   : > { %3172 = vmatmul.mubr.msk.bf16.vlgmr.msra.gmra.mrb[16].mxu1 %vm663_vm2, %v655_v2 }
 0x2b7   : > { %3183 = vmatprep.mubr.msk.bf16.mxu1 %vm3591_vm1, %v3590_v9 }
 0x379   : > { %v704_v8 = vpop.f32.mrb[4].mxu0 }
 0x37a   : > { %v705_v10 = vadd.f32 %v704_v8, %v3814_v7  ;;  %v3155_v11 = vpop.f32.mrb[5].mxu0 }
 0x37b   : > { %v707_v12 = vpop.f32.mrb[6].mxu0 }
 0x37c   : > { %v3156_v13 = vpop.f32.mrb[7].mxu0  ;;  %v857_v14 = vsel %vm663_vm2, %v705_v10, -inf }
 0x37d   : > { %858 = vmax.xlane.f32.xlu1 %v857_v14 }
 0x381   : > { %v753_v15 = vpop.f32.mrb[12].mxu1  ;;  %v802_v16 = vpop.f32.mrb[8].mxu0 }
 0x382   : > { %v754_v17 = vadd.f32 %v753_v15, %v3814_v7  ;;  %v803_v18 = vadd.f32 %v802_v16, %v3814_v7  ;;  %v3161_v19 = vpop.f32.mrb[13].mxu1  ;;  %v3167_v20 = vpop.f32.mrb[9].mxu0 }
 0x383   : > { %v756_v21 = vpop.f32.mrb[14].mxu1  ;;  %v805_v22 = vpop.f32.mrb[10].mxu0 }
 0x384   : > { %v3162_v23 = vpop.f32.mrb[15].mxu1  ;;  %v3168_v24 = vpop.f32.mrb[11].mxu0  ;;  %v863_v25 = vsel %vm663_vm2, %v803_v18, -inf  ;;  %v860_v28 = vsel %vm663_vm2, %v754_v17, -inf }
 0x385   : > { %864 = vmax.xlane.f32.xlu1 %v863_v25  ;;  %861 = vmax.xlane.f32.xlu0 %v860_v28 }
 0x389   : > { %v851_v29 = vpop.f32.mrb[16].mxu1 }
 0x38a   : > { %v852_v30 = vadd.f32 %v851_v29, %v3814_v7  ;;  %v3173_v31 = vpop.f32.mrb[17].mxu1 }
 0x38b   : > { %v854_v32 = vpop.f32.mrb[18].mxu1  ;;  %v1110_v31 = vld [vmem:[%s4319_s5] sm:$0xf] }
 0x38c   : > { %v3174_v33 = vpop.f32.mrb[19].mxu1  ;;  %v866_v34 = vsel %vm663_vm2, %v852_v30, -inf }
 0x38d   : > { %867 = vmax.xlane.f32.xlu1 %v866_v34  ;;  %v1118_v34 = vsel %vm915_vm4, %v1110_v31, 0 }
 0x39b   : > { %638 = vrot.lane.b32.xlu0 %v2901_v35, %s3594_s8  ;;  %v1111_v35 = vld [vmem:[%s4319_s5 + $0x4] sm:$0xf] }
 0x39e   : > { %636 = vrot.lane.b32.xlu1 %v2900_v37, %s3594_s8 }
 0x3a2   : > { %640 = vrot.lane.b32.xlu1 %v2902_v38, %s3594_s8  ;;  %v1164_v38 = vsel %vm915_vm4, %v1111_v35, 0 }
 0x3a6   : > { %642 = vrot.lane.b32.xlu1 %v2903_v39, %s3594_s8  ;;  %v1112_v39 = vld [vmem:[%s4319_s5 + $0x8] sm:$0xf] }
 0x40a   : > { %v859_v40 = vpop.xlane.xlu1 %858 }
 0x40b   : > { %v869_v51 = vsub.f32 %v705_v10, %v859_v40 }
 0x40d   : > { %v873_v53 = vmul.f32 1.442695, %v869_v51 }
 0x40f   : > { %3478 = vpow2.f32 %v873_v53 }
 0x412   : > { %v862_v42 = vpop.xlane.xlu0 %861  ;;  %v865_v43 = vpop.xlane.xlu1 %864 }
 0x413   : > { %v870_v52 = vsub.f32 %v754_v17, %v862_v42  ;;  %v871_v55 = vsub.f32 %v803_v18, %v865_v43 }
 0x415   : > { %v875_v56 = vmul.f32 1.442695, %v870_v52 }
 0x416   : > { %v639_v44 = vpop.permute.xlu0 %638 }
 0x417   : > { %v649_v45 = vadd.f32 %v639_v44, %v3768_v36  ;;  %v877_v36 = vmul.f32 1.442695, %v871_v55  ;;  %3480 = vpow2.f32 %v875_v56  ;;  %v1210_v44 = vsel %vm915_vm4, %v1112_v39, 0  ;;  %v2917_v39 = vld [vmem:[%s4316_s2 + $0x3] ss:$0 sm:$0xff] }
 0x419   : > { %v906_v46 = vpack.c.bf16 %v649_v45, %v649_v45  ;;  %v3479_v58 = vpop.eup %3478  ;;  %v1113_v45 = vld [vmem:[%s4319_s5 + $0xc] sm:$0xf] }
 0x41a   : > { %v868_v47 = vpop.xlane.xlu1 %867  ;;  %v881_v60 = vsel %vm663_vm2, %v3479_v58, 0.0  ;;  %v1256_v51 = vsel %vm915_vm4, %v1113_v45, 0 }
 0x41b   : > { %960 = vrot.lane.b32.xlu1 %v906_v46, %s3595_s21  ;;  %v872_v54 = vsub.f32 %v852_v30, %v868_v47 }
 0x41d   : > { %v879_v57 = vmul.f32 1.442695, %v872_v54 }
 0x41e   : > { %v637_v48 = vpop.permute.xlu1 %636 }
 0x41f   : > { %v648_v49 = vadd.f32 %v637_v48, %v3758_v26  ;;  %3482 = vpow2.f32 %v879_v57 }
 0x420   : > { %3484 = vpow2.f32 %v877_v36 }
 0x421   : > { %v905_v50 = vpack.c.bf16 %v648_v49, %v648_v49  ;;  %v3481_v59 = vpop.eup %3480 }
 0x422   : > { %v884_v61 = vsel %vm663_vm2, %v3481_v59, 0.0  ;;  %v641_v2 = vpop.permute.xlu1 %640 }
 0x423   : > { %910 = vrot.lane.b32.xlu0 %v905_v50, %s3595_s21  ;;  %v650_v3 = vadd.f32 %v641_v2, %v3760_v27 }
 0x425   : > { %v907_v4 = vpack.c.bf16 %v650_v3, %v650_v3 }
 0x426   : > { %v643_v5 = vpop.permute.xlu1 %642 }
 0x427   : > { %v651_v6 = vadd.f32 %v643_v5, %v3773_v41 }
 0x429   : > { %v3483_v26 = vpop.eup %3482  ;;  %v908_v8 = vpack.c.bf16 %v651_v6, %v651_v6 }
 0x42a   : > { %v3485_v62 = vpop.eup %3484  ;;  %v890_v63 = vsel %vm663_vm2, %v3483_v26, 0.0 }
 0x42b   : > { %v887_v1 = vsel %vm663_vm2, %v3485_v62, 0.0 }
 0x43f   : > { %882 = vadd.xlane.f32.xlu1 %v881_v60 }
 0x442   : > { %885 = vadd.xlane.f32.xlu0 %v884_v61 }
 0x443   : > { %891 = vadd.xlane.f32.xlu1 %v890_v63 }
 0x446   : > { %888 = vadd.xlane.f32.xlu0 %v887_v1 }
 0x454   : > { %1009 = vrot.lane.b32.xlu1 %v907_v4, %s3595_s21 }
 0x45c   : > { %1058 = vrot.lane.b32.xlu0 %v908_v8, %s3595_s21 }
 0x48d   : > { %v961_v10 = vpop.permute.xlu1 %960 }
 0x48e   : > { %v966_v11 = vsel %vm915_vm4, %v961_v10, 0 }
 0x48f   : > { %3182 = vmatpush3.bf16.msra.mxu1 %v966_v11 }
 0x490   : > { %3193 = vmatprep.subr.bf16.mxu1 %v3590_v9 }
 0x495   : > { %v911_v12 = vpop.permute.xlu0 %910 }
 0x496   : > { %v917_v13 = vsel %vm915_vm4, %v911_v12, 0 }
 0x497   : > { %3176 = vmatpush3.bf16.msra.mxu0 %v917_v13 }
 0x498   : > { %3187 = vmatprep.subr.bf16.mxu0 %v3590_v9 }
 0x4cc   : > { %v883_v27 = vpop.xlane.xlu1 %882 }
 0x4cd   : > { %3486 = vrcp.f32 %v883_v27 }
 0x4cf   : > { %v886_v14 = vpop.xlane.xlu0 %885 }
 0x4d0   : > { %3488 = vrcp.f32 %v886_v14  ;;  %v892_v41 = vpop.xlane.xlu1 %891 }
 0x4d1   : > { %3490 = vrcp.f32 %v892_v41 }
 0x4d3   : > { %v889_v15 = vpop.xlane.xlu0 %888 }
 0x4d4   : > { %3492 = vrcp.f32 %v889_v15  ;;  %v1010_v18 = vpop.permute.xlu1 %1009 }
 0x4d5   : > { %v1015_v22 = vsel %vm915_vm4, %v1010_v18, 0 }
 0x4d7   : > { %v3487_v16 = vpop.eup %3486  ;;  %v1059_v23 = vpop.permute.xlu0 %1058 }
 0x4d8   : > { %v897_v17 = vmul.f32 %v3487_v16, %v3479_v58  ;;  %v1064_v30 = vsel %vm915_vm4, %v1059_v23, 0 }
 0x4da   : > { %v3489_v19 = vpop.eup %3488  ;;  %v901_v20 = vpack.c.bf16 %v897_v17, %v897_v17 }
 0x4db   : > { %v898_v21 = vmul.f32 %v3489_v19, %v3481_v59  ;;  %v3491_v24 = vpop.eup %3490 }
 0x4dc   : > { %3178 = vmatmul.mubr.msk.bf16.vlgmr.msra.gmra.mrb[12].mxu0 %vm663_vm2, %v901_v20  ;;  %v900_v32 = vmul.f32 %v3491_v24, %v3483_v26 }
 0x4dd   : > { %3188 = vmatpush3.bf16.msra.mxu0 %v1015_v22  ;;  %v902_v25 = vpack.c.bf16 %v898_v21, %v898_v21  ;;  %3189 = vmatprep.mubr.msk.bf16.mxu0 %vm3591_vm1, %v3590_v9  ;;  %v2916_v22 = vld [vmem:[%s4316_s2 + $0x2] ss:$0 sm:$0xff] }
 0x4de   : > { %v3493_v28 = vpop.eup %3492  ;;  %3199 = vmatprep.subr.bf16.mxu0 %v3590_v9  ;;  %v904_v37 = vpack.c.bf16 %v900_v32, %v900_v32 }
 0x4df   : > { %v899_v29 = vmul.f32 %v3493_v28, %v3485_v62  ;;  %3184 = vmatmul.mubr.msk.bf16.vlgmr.msra.gmra.mrb[20].mxu1 %vm663_vm2, %v902_v25 }
 0x4e0   : > { %3194 = vmatpush3.bf16.msra.mxu1 %v1064_v30  ;;  %3195 = vmatprep.mubr.msk.bf16.mxu1 %vm3591_vm1, %v3590_v9 }
 0x4e1   : > { %v903_v33 = vpack.c.bf16 %v899_v29, %v899_v29  ;;  %3205 = vmatprep.subr.bf16.mxu1 %v3590_v9 }
 0x4e4   : > { %3190 = vmatmul.mubr.msk.bf16.vlgmr.msra.gmra.mrb[16].mxu0 %vm663_vm2, %v903_v33  ;;  %v3446_v33 = vld [vmem:[%s4320_s6] sm:$0xff]  }
 0x4e5   : > { %3200 = vmatpush3.bf16.msra.mxu0 %v1118_v34  ;;  %3201 = vmatprep.mubr.msk.bf16.mxu0 %vm3591_vm1, %v3590_v9 }
 0x4e6   : > { %3211 = vmatprep.subr.bf16.mxu0 %v3590_v9 }
 0x4e7   : > { %3196 = vmatmul.mubr.msk.bf16.vlgmr.msra.gmra.mrb[24].mxu1 %vm663_vm2, %v904_v37 }
 0x4e8   : > { %3206 = vmatpush3.bf16.msra.mxu1 %v1164_v38  ;;  %3207 = vmatprep.mubr.msk.bf16.mxu1 %vm3591_vm1, %v3590_v9 }
 0x4e9   : > { %3217 = vmatprep.subr.bf16.mxu1 %v3590_v9 }
 0x5af   : > { %v953_v40 = vpop.f32.mrb[12].mxu0 }
 0x5b0   : > { %v1106_v42 = vpack.c.bf16 %v953_v40, %v953_v40  ;;  %v3179_v43 = vpop.f32.mrb[13].mxu0 }
 0x5b1   : > { %v956_v46 = vpop.f32.mrb[14].mxu0 }
 0x5b2   : > { %v3180_v47 = vpop.f32.mrb[15].mxu0  ;;  %v1002_v48 = vpop.f32.mrb[20].mxu1  ;;  %3202 = vmatmul.mubr.msk.bf16.vlgmr.msra.gmra.mrb[20].mxu0 %vm663_vm2, %v1106_v42  ;;  %v2918_v42 = vld [vmem:[%s4316_s2 + $0x4] ss:$0 sm:$0xff]  ;;  %v3448_v46 = vld [vmem:[%s4320_s6 + $0x10] sm:$0xff]  }
 0x5b3   : > { %v1107_v49 = vpack.c.bf16 %v1002_v48, %v1002_v48  ;;  %v3185_v50 = vpop.f32.mrb[21].mxu1  ;;  %3212 = vmatpush3.bf16.msra.mxu0 %v1210_v44  ;;  %3213 = vmatprep.mubr.msk.bf16.mxu0 %vm3591_vm1, %v3590_v9  ;;  %v3449_v47 = vld [vmem:[%s4320_s6 + $0x18] sm:$0xff]   ;;  %v3450_v48 = vld [vmem:[%s4320_s6 + $0x20] sm:$0xff]  }
 0x5b4   : > { %v1005_v52 = vpop.f32.mrb[22].mxu1  ;;  %3223 = vmatprep.subr.bf16.mxu0 %v3590_v9  ;;  %v3452_v50 = vld [vmem:[%s4320_s6 + $0x30] sm:$0xff]  }
 0x5b5   : > { %v3186_v53 = vpop.f32.mrb[23].mxu1  ;;  %3208 = vmatmul.mubr.msk.bf16.vlgmr.msra.gmra.mrb[28].mxu1 %vm663_vm2, %v1107_v49  ;;  %v3451_v49 = vld [vmem:[%s4320_s6 + $0x28] sm:$0xff]   ;;  %v3454_v52 = vld [vmem:[%s4320_s6 + $0x40] sm:$0xff]  }
 0x5b6   : > { %3218 = vmatpush3.bf16.msra.mxu1 %v1256_v51  ;;  %3219 = vmatprep.mubr.msk.bf16.mxu1 %vm3591_vm1, %v3590_v9  ;;  %v3453_v51 = vld [vmem:[%s4320_s6 + $0x38] sm:$0xff]   ;;  %v3455_v53 = vld [vmem:[%s4320_s6 + $0x48] sm:$0xff]  }
 0x5b7   : > { %v1051_v54 = vpop.f32.mrb[16].mxu0  ;;  %3231 = vmatprep.subr.bf16.mxu1 %v3590_v9 }
 0x5b8   : > { %v1108_v55 = vpack.c.bf16 %v1051_v54, %v1051_v54  ;;  %v3191_v56 = vpop.f32.mrb[17].mxu0  ;;  %v2919_v54 = vld [vmem:[%s4316_s2 + $0x6] ss:$0 sm:$0xff] }
 0x5b9   : > { %v1054_v57 = vpop.f32.mrb[18].mxu0 }
 0x5ba   : > { %v3192_v36 = vpop.f32.mrb[19].mxu0  ;;  %v1100_v58 = vpop.f32.mrb[24].mxu1  ;;  %3214 = vmatmul.mubr.msk.bf16.vlgmr.msra.gmra.mrb[24].mxu0 %vm663_vm2, %v1108_v55 }
 0x5bb   : > { %v1109_v59 = vpack.c.bf16 %v1100_v58, %v1100_v58  ;;  %v3197_v60 = vpop.f32.mrb[25].mxu1  ;;  %3227 = vmatprep.mubr.msk.bf16.mxu0 %vm3591_vm1, %v3590_v9  ;;  %3224 = vmatpush3.bf16.msra.mxu0 %v3446_v33  ;;  %v3462_v33 = vld [vmem:[%s4318_s4 + $0x70] sm:$0xff]  }
 0x5bc   : > { %v1103_v26 = vpop.f32.mrb[26].mxu1  ;;  %3225 = vmatprep.subr.bf16.mxu0 %v3590_v9 }
 0x5bd   : > { %v3198_v61 = vpop.f32.mrb[27].mxu1  ;;  %3220 = vmatmul.mubr.msk.bf16.vlgmr.msra.gmra.mrb[32].mxu1 %vm663_vm2, %v1109_v59 }
 0x5be   : > { %3247 = vmatprep.mubr.msk.bf16.mxu1 %vm3591_vm1, %v3590_v9  ;;  %3232 = vmatpush3.bf16.msra.mxu1 %v3448_v46 }
 0x5bf   : > { %3233 = vmatprep.subr.bf16.mxu1 %v3590_v9 }
 0x5c2   : > { %3234 = vmatpush3.bf16.msra.mxu1 %v3449_v47 }
 0x5c3   : > { %3235 = vmatprep.subr.bf16.mxu1 %v3590_v9 }
 0x5c6   : > { %3236 = vmatpush3.bf16.msra.mxu1 %v3450_v48 }
 0x5c7   : > { %3237 = vmatprep.subr.bf16.mxu1 %v3590_v9 }
 0x5ca   : > { %3238 = vmatpush3.bf16.msra.mxu1 %v3451_v49 }
 0x5cb   : > { %3239 = vmatprep.subr.bf16.mxu1 %v3590_v9 }
 0x5ce   : > { %3240 = vmatpush3.bf16.msra.mxu1 %v3452_v50 }
 0x5cf   : > { %3241 = vmatprep.subr.bf16.mxu1 %v3590_v9 }
 0x5d2   : > { %3242 = vmatpush3.bf16.msra.mxu1 %v3453_v51 }
 0x5d3   : > { %3243 = vmatprep.subr.bf16.mxu1 %v3590_v9 }
 0x5d6   : > { %3244 = vmatpush3.bf16.msra.mxu1 %v3454_v52 }
 0x5d7   : > { %3245 = vmatprep.subr.bf16.mxu1 %v3590_v9 }
 0x5da   : > { %3246 = vmatpush3.bf16.msra.mxu1 %v3455_v53 }
 0x5db   : > { %3283 = vmatprep.subr.bf16.mxu1 %v3590_v9 }
 0x685   : > { %v1154_v62 = vpop.f32.mrb[20].mxu0 }
 0x686   : > { %v3203_v63 = vpop.f32.mrb[21].mxu0  ;;  %v1298_v4 = vsel %vm335_vm0, %v1154_v62, 0.0 }
 0x687   : > { %v1157_v1 = vpop.f32.mrb[22].mxu0 }
 0x688   : > { %v3204_v2 = vpop.f32.mrb[23].mxu0  ;;  %v1200_v3 = vpop.f32.mrb[28].mxu1 }
 0x689   : > { %v1299_v5 = vsel %vm335_vm0, %v1200_v3, 0.0  ;;  %v3209_v6 = vpop.f32.mrb[29].mxu1  ;;  %v2924_v2 = vld [vmem:[%s4316_s2 + $0x5] ss:$0 sm:$0xff] }
 0x68a   : > { %v1300_v8 = vadd.f32 %v1299_v5, %v1298_v4  ;;  %v1203_v10 = vpop.f32.mrb[30].mxu1 }
 0x68b   : > { %v3210_v11 = vpop.f32.mrb[31].mxu1 }
 0x68d   : > { %v1246_v12 = vpop.f32.mrb[24].mxu0 }
 0x68e   : > { %v1301_v13 = vsel %vm335_vm0, %v1246_v12, 0.0  ;;  %v3215_v27 = vpop.f32.mrb[25].mxu0 }
 0x68f   : > { %v1302_v14 = vadd.f32 %v1301_v13, %v1300_v8  ;;  %v1249_v41 = vpop.f32.mrb[26].mxu0 }
 0x690   : > { %v3216_v15 = vpop.f32.mrb[27].mxu0  ;;  %v1292_v16 = vpop.f32.mrb[32].mxu1 }
 0x691   : > { %v1303_v17 = vsel %vm335_vm0, %v1292_v16, 0.0  ;;  %v3221_v18 = vpop.f32.mrb[33].mxu1  ;;  %v3456_v15 = vld [vmem:[%s4318_s4 + $0x40] sm:$0xff]   ;;  %v3457_v16 = vld [vmem:[%s4318_s4 + $0x48] sm:$0xff]  }
 0x692   : > { %v1304_v19 = vadd.f32 %v1303_v17, %v1302_v14  ;;  %v1295_v20 = vpop.f32.mrb[34].mxu1 }
 0x693   : > { %v3222_v21 = vpop.f32.mrb[35].mxu1 }
 0x694   : > { %v1305_v23 = vadd.f32 %v1304_v19, %v3696_v0  ;;  %v3447_v0 = vld [vmem:[%s4320_s6 + $0x8] sm:$0xff]   ;;  %v2941_v21 = vld [vmem:[%s4316_s2 + $0x7] ss:$0 sm:$0xff] }
 0x695   : > { %3226 = vmatpush3.bf16.msra.mxu0 %v3447_v0  ;;  %v3463_v0 = vld [vmem:[%s4318_s4 + $0x78] sm:$0xff]  }
 0x696   : > { %v3912_v24 = vadd.f32 %v2916_v22, %v1305_v23  ;;  %3251 = vmatprep.subr.bf16.mxu0 %v3590_v9  ;;  %v2942_v23 = vld [vmem:[%s4316_s2 + $0x8] ss:$0 sm:$0xff] }
 0x698   : > { %v1311_v25 = vsel %vm335_vm0, %v3912_v24, 0.0 }
 0x699   : > { %1312 = vadd.xlane.f32.xlu1 %v1311_v25 }
 0x726   : > { %v1313_v28 = vpop.xlane.xlu1 %1312 }
 0x727   : > { %v1314_v29 = vmul.f32 0.03125, %v1313_v28  ;;  %v3458_v28 = vld [vmem:[%s4318_s4 + $0x50] sm:$0xff]  }
 0x729   : > { %v1315_v30 = vsub.f32 %v3912_v24, %v1314_v29 }
 0x72b   : > { %v1316_v31 = vmul.f32 %v1315_v30, %v1315_v30 }
 0x72d   : > { %v1317_v32 = vsel %vm335_vm0, %v1316_v31, 0.0  ;;  %v3460_v31 = vld [vmem:[%s4318_s4 + $0x60] sm:$0xff]  }
 0x72e   : > { %1318 = vadd.xlane.f32.xlu0 %v1317_v32  ;;  %v3461_v32 = vld [vmem:[%s4318_s4 + $0x68] sm:$0xff]  }
 0x7bb   : > { %v1319_v34 = vpop.xlane.xlu0 %1318 }
 0x7bc   : > { %v1320_v35 = vmul.f32 0.03125, %v1319_v34 }
 0x7be   : > { %v1321_v37 = vadd.f32 1e-05, %v1320_v35 }
 0x7c0   : > { %3494 = vrsqrt.f32 %v1321_v37 }
 0x7ca   : > { %v3495_v38 = vpop.eup %3494 }
 0x7cb   : > { %v1323_v40 = vmul.f32 %v3495_v38, %v1315_v30  ;;  %v3459_v30 = vld [vmem:[%s4318_s4 + $0x58] sm:$0xff]  }
 0x7cd   : > { %v1328_v43 = vmul.f32 %v2917_v39, %v1323_v40 }
 0x7cf   : > { %v1333_v44 = vadd.f32 %v2918_v42, %v1328_v43 }
 0x7d1   : > { %v1334_v45 = vpack.c.bf16 %v1333_v44, %v1333_v44 }
 0x7d3   : > { %3228 = vmatmul.mubr.msk.bf16.vlgmr.msra.gmra.mrb[28].mxu0 %vm335_vm0, %v1334_v45 }
 0x7d4   : > { %3255 = vmatprep.mubr.msk.bf16.mxu0 %vm3591_vm1, %v3590_v9  ;;  %3252 = vmatpush3.bf16.msra.mxu0 %v3456_v15 }
 0x7d5   : > { %3253 = vmatprep.subr.bf16.mxu0 %v3590_v9 }
 0x7d8   : > { %3254 = vmatpush3.bf16.msra.mxu0 %v3457_v16 }
 0x7d9   : > { %3259 = vmatprep.subr.bf16.mxu0 %v3590_v9 }
 0x8a6   : > { %v1388_v55 = vpop.f32.mrb[28].mxu0 }
 0x8a7   : > { %v1389_v56 = vadd.f32 %v2919_v54, %v1388_v55  ;;  %v3229_v57 = vpop.f32.mrb[29].mxu0 }
 0x8a8   : > { %v1391_v36 = vpop.f32.mrb[30].mxu0 }
 0x8a9   : > { %v2923_v58 = vmul.f32 -1.702, %v1389_v56  ;;  %v3230_v59 = vpop.f32.mrb[31].mxu0 }
 0x8ab   : > { %v1396_v60 = vmul.f32 1.442695, %v2923_v58 }
 0x8ad   : > { %3496 = vpow2.f32 %v1396_v60  ;;  %v2972_v60 = vld [vmem:[%s4317_s3 + $0x9] ss:$0 sm:$0xff] }
 0x8b7   : > { %v3497_v26 = vpop.eup %3496 }
 0x8b8   : > { %v1398_v61 = vadd.f32 1.0, %v3497_v26 }
 0x8ba   : > { %3498 = vrcp.f32 %v1398_v61 }
 0x8c4   : > { %v3499_v62 = vpop.eup %3498 }
 0x8c5   : > { %v1401_v63 = vmul.f32 %v3499_v62, %v1389_v56  ;;  %v2971_v56 = vld [vmem:[%s4317_s3 + $0x8] ss:$0 sm:$0xff] }
 0x8c7   : > { %v1402_v1 = vpack.c.bf16 %v1401_v63, %v1401_v63 }
 0x8c9   : > { %3248 = vmatmul.mubr.bf16.vlgmr.msra.gmra.mrb[36].mxu1 %v1402_v1  ;;  %v2973_v1 = vld [vmem:[%s4317_s3 + $0xa] ss:$0 sm:$0xff] }
 0x8ca   : > { %3285 = vmatprep.mubr.msk.bf16.mxu1 %vm3591_vm1, %v3590_v9 }
 0x99c   : > { %v1489_v3 = vpop.f32.mrb[36].mxu1 }
 0x99d   : > { %v1490_v4 = vadd.f32 %v2924_v2, %v1489_v3  ;;  %v3249_v5 = vpop.f32.mrb[37].mxu1 }
 0x99e   : > { %v1492_v6 = vpop.f32.mrb[38].mxu1 }
 0x99f   : > { %v3976_v8 = vadd.f32 %v1490_v4, %v3912_v24  ;;  %v3250_v10 = vpop.f32.mrb[39].mxu1  ;;  %v2974_v6 = vld [vmem:[%s4317_s3 + $0xb] ss:$0 sm:$0xff] }
 0x9a1   : > { %v1533_v11 = vsel %vm335_vm0, %v3976_v8, 0.0 }
 0x9a2   : > { %1534 = vadd.xlane.f32.xlu0 %v1533_v11 }
 0xa2f   : > { %v1535_v12 = vpop.xlane.xlu0 %1534 }
 0xa30   : > { %v1536_v13 = vmul.f32 0.03125, %v1535_v12 }
 0xa32   : > { %v1537_v27 = vsub.f32 %v3976_v8, %v1536_v13 }
 0xa34   : > { %v1538_v14 = vmul.f32 %v1537_v27, %v1537_v27 }
 0xa36   : > { %v1539_v41 = vsel %vm335_vm0, %v1538_v14, 0.0 }
 0xa37   : > { %1540 = vadd.xlane.f32.xlu1 %v1539_v41 }
 0xac4   : > { %v1541_v17 = vpop.xlane.xlu1 %1540 }
 0xac5   : > { %v1542_v18 = vmul.f32 0.03125, %v1541_v17 }
 0xac7   : > { %v1543_v19 = vadd.f32 1e-05, %v1542_v18 }
 0xac9   : > { %3500 = vrsqrt.f32 %v1543_v19 }
 0xad3   : > { %v3501_v20 = vpop.eup %3500 }
 0xad4   : > { %v1545_v22 = vmul.f32 %v3501_v20, %v1537_v27 }
 0xad6   : > { %v1550_v24 = vmul.f32 %v2941_v21, %v1545_v22 }
 0xad8   : > { %v1555_v25 = vadd.f32 %v2942_v23, %v1550_v24 }
 0xada   : > { %v1556_v29 = vpack.c.bf16 %v1555_v25, %v1555_v25 }
 0xadc   : > { %3256 = vmatmul.mubr.msk.bf16.vlgmr.msra.gmra.mrb[32].mxu0 %vm335_vm0, %v1556_v29 }
 0xadd   : > { %3260 = vmatpush3.bf16.msra.mxu0 %v3458_v28  ;;  %3263 = vmatprep.mubr.msk.bf16.mxu0 %vm3591_vm1, %v3590_v9 }
 0xade   : > { %3261 = vmatprep.subr.bf16.mxu0 %v3590_v9 }
 0xae1   : > { %3262 = vmatpush3.bf16.msra.mxu0 %v3459_v30 }
 0xae2   : > { %3267 = vmatprep.subr.bf16.mxu0 %v3590_v9 }
 0xae4   : > { %3264 = vmatmul.mubr.msk.bf16.vlgmr.msra.gmra.mrb[36].mxu0 %vm335_vm0, %v1556_v29 }
 0xae5   : > { %3268 = vmatpush3.bf16.msra.mxu0 %v3460_v31  ;;  %3271 = vmatprep.mubr.msk.bf16.mxu0 %vm3591_vm1, %v3590_v9 }
 0xae6   : > { %3269 = vmatprep.subr.bf16.mxu0 %v3590_v9 }
 0xae9   : > { %3270 = vmatpush3.bf16.msra.mxu0 %v3461_v32 }
 0xaea   : > { %3275 = vmatprep.subr.bf16.mxu0 %v3590_v9 }
 0xaec   : > { %3272 = vmatmul.mubr.msk.bf16.vlgmr.msra.gmra.mrb[40].mxu0 %vm335_vm0, %v1556_v29 }
 0xaed   : > { %3276 = vmatpush3.bf16.msra.mxu0 %v3462_v33  ;;  %3279 = vmatprep.mubr.msk.bf16.mxu0 %vm3591_vm1, %v3590_v9 }
 0xaee   : > { %3277 = vmatprep.subr.bf16.mxu0 %v3590_v9 }
 0xaf1   : > { %3278 = vmatpush3.bf16.msra.mxu0 %v3463_v0 }
 0xaf2   : > { %3289 = vmatprep.subr.bf16.mxu0 %v3590_v9 }
 0xaf4   : > { %3280 = vmatmul.mubr.msk.bf16.vlgmr.msra.gmra.mrb[44].mxu0 %vm335_vm0, %v1556_v29 }
 0xaf5   : > { %3291 = vmatprep.mubr.msk.bf16.mxu0 %vm3591_vm1, %v3590_v9 }
 0xbaf   : > { %v4032_v34 = vpop.f32.mrb[32].mxu0 }
 0xbb0   : > { %v1853_v35 = vpack.c.bf16 %v4032_v34, %v4032_v34  ;;  %v3257_v37 = vpop.f32.mrb[33].mxu0  ;;  %v1809_v58 = vadd.f32 %v2971_v56, %v4032_v34 }
 0xbb1   : > { %v1626_v38 = vpop.f32.mrb[34].mxu0 }
 0xbb2   : > { %1858 = vrot.lane.b32.xlu0 %v1853_v35, %s3592_s9  ;;  %v3258_v39 = vpop.f32.mrb[35].mxu0  ;;  %v1849_v59 = vpack.c.bf16 %v1809_v58, %v1809_v58 }
 0xbb3   : > { %v2975_v39 = vld [vmem:[%s4317_s3 + $0xc] ss:$0 sm:$0xff] }
 0xbb7   : > { %v4037_v40 = vpop.f32.mrb[36].mxu0 }
 0xbb8   : > { %v1854_v42 = vpack.c.bf16 %v4037_v40, %v4037_v40  ;;  %v3265_v43 = vpop.f32.mrb[37].mxu0  ;;  %v1810_v62 = vadd.f32 %v2972_v60, %v4037_v40 }
 0xbb9   : > { %v1678_v44 = vpop.f32.mrb[38].mxu0  ;;  %v2977_v43 = vld [vmem:[%s4317_s3 + $0xe] ss:$0 sm:$0xff] }
 0xbba   : > { %1907 = vrot.lane.b32.xlu1 %v1854_v42, %s3592_s9  ;;  %v3266_v45 = vpop.f32.mrb[39].mxu0  ;;  %v1850_v63 = vpack.c.bf16 %v1810_v62, %v1810_v62  ;;  %v2976_v42 = vld [vmem:[%s4317_s3 + $0xd] ss:$0 sm:$0xff] }
 0xbbf   : > { %v4042_v46 = vpop.f32.mrb[40].mxu0 }
 0xbc0   : > { %v1855_v47 = vpack.c.bf16 %v4042_v46, %v4042_v46  ;;  %v3273_v48 = vpop.f32.mrb[41].mxu0  ;;  %v1811_v4 = vadd.f32 %v2973_v1, %v4042_v46 }
 0xbc1   : > { %v1730_v49 = vpop.f32.mrb[42].mxu0 }
 0xbc2   : > { %1956 = vrot.lane.b32.xlu1 %v1855_v47, %s3592_s9  ;;  %v3274_v50 = vpop.f32.mrb[43].mxu0  ;;  %v1851_v5 = vpack.c.bf16 %v1811_v4, %v1811_v4 }
 0xbc7   : > { %v4047_v51 = vpop.f32.mrb[44].mxu0 }
 0xbc8   : > { %v1856_v52 = vpack.c.bf16 %v4047_v51, %v4047_v51  ;;  %v3281_v53 = vpop.f32.mrb[45].mxu0  ;;  %v1812_v12 = vadd.f32 %v2974_v6, %v4047_v51 }
 0xbc9   : > { %v1782_v54 = vpop.f32.mrb[46].mxu0 }
 0xbca   : > { %2005 = vrot.lane.b32.xlu0 %v1856_v52, %s3592_s9  ;;  %v3282_v55 = vpop.f32.mrb[47].mxu0  ;;  %v1852_v13 = vpack.c.bf16 %v1812_v12, %v1812_v12 }
 0xc24   : > { %v1859_v57 = vpop.permute.xlu0 %1858 }
 0xc25   : > { %v1864_v36 = vsel %vm663_vm2, %v1859_v57, 0 }
 0xc26   : > { %3284 = vmatpush3.bf16.xpose.msra.mxu1 %v1864_v36 }
 0xc27   : > { %3295 = vmatprep.subr.bf16.mxu1 %v3590_v9 }
 0xc2c   : > { %v1908_v26 = vpop.permute.xlu1 %1907 }
 0xc2d   : > { %v1913_v61 = vsel %vm663_vm2, %v1908_v26, 0  ;;  %3286 = vmatmul.mubr.msk.bf16.vlgmr.msra.gmra.mrb[40].mxu1 %vm663_vm2, %v1849_v59 }
 0xc2e   : > { %3290 = vmatpush3.bf16.xpose.msra.mxu0 %v1913_v61  ;;  %3297 = vmatprep.mubr.msk.bf16.mxu1 %vm3591_vm1, %v3590_v9 }
 0xc2f   : > { %3301 = vmatprep.subr.bf16.mxu0 %v3590_v9 }
 0xc34   : > { %v1957_v2 = vpop.permute.xlu1 %1956 }
 0xc35   : > { %v1962_v3 = vsel %vm663_vm2, %v1957_v2, 0  ;;  %3292 = vmatmul.mubr.msk.bf16.vlgmr.msra.gmra.mrb[48].mxu0 %vm663_vm2, %v1850_v63 }
 0xc36   : > { %3296 = vmatpush3.bf16.xpose.msra.mxu1 %v1962_v3  ;;  %3303 = vmatprep.mubr.msk.bf16.mxu0 %vm3591_vm1, %v3590_v9 }
 0xc37   : > { %3307 = vmatprep.subr.bf16.mxu1 %v3590_v9 }
 0xc3c   : > { %v2006_v10 = vpop.permute.xlu0 %2005 }
 0xc3d   : > { %v2011_v11 = vsel %vm663_vm2, %v2006_v10, 0  ;;  %3298 = vmatmul.mubr.msk.bf16.vlgmr.msra.gmra.mrb[44].mxu1 %vm663_vm2, %v1851_v5 }
 0xc3e   : > { %3302 = vmatpush3.bf16.xpose.msra.mxu0 %v2011_v11  ;;  %3309 = vmatprep.mubr.msk.bf16.mxu1 %vm3591_vm1, %v3590_v9 }
 0xc3f   : > { %3313 = vmatprep.subr.bf16.mxu0 %v3590_v9 }
 0xc45   : > { %3304 = vmatmul.mubr.msk.bf16.vlgmr.msra.gmra.mrb[52].mxu0 %vm663_vm2, %v1852_v13 }
 0xc46   : > { %3315 = vmatprep.mubr.msk.bf16.mxu0 %vm3591_vm1, %v3590_v9 }
 0xd00   : > { %v1900_v27 = vpop.f32.mrb[40].mxu1 }
 0xd01   : > { %v1901_v14 = vadd.f32 %v1900_v27, %v3814_v7  ;;  %v3287_v41 = vpop.f32.mrb[41].mxu1 }
 0xd02   : > { %v1903_v15 = vpop.f32.mrb[42].mxu1 }
 0xd03   : > { %v3288_v16 = vpop.f32.mrb[43].mxu1  ;;  %v2053_v17 = vsel %vm663_vm2, %v1901_v14, -inf }
 0xd04   : > { %2054 = vmax.xlane.f32.xlu1 %v2053_v17 }
 0xd08   : > { %v1949_v18 = vpop.f32.mrb[48].mxu0 }
 0xd09   : > { %v1950_v19 = vadd.f32 %v1949_v18, %v3814_v7  ;;  %v3293_v20 = vpop.f32.mrb[49].mxu0 }
 0xd0a   : > { %v1952_v21 = vpop.f32.mrb[50].mxu0 }
 0xd0b   : > { %v3294_v22 = vpop.f32.mrb[51].mxu0  ;;  %v2056_v23 = vsel %vm663_vm2, %v1950_v19, -inf }
 0xd0c   : > { %2057 = vmax.xlane.f32.xlu0 %v2056_v23 }
 0xd10   : > { %v1998_v24 = vpop.f32.mrb[44].mxu1 }
 0xd11   : > { %v1999_v25 = vadd.f32 %v1998_v24, %v3814_v7  ;;  %v3299_v28 = vpop.f32.mrb[45].mxu1 }
 0xd12   : > { %v2001_v29 = vpop.f32.mrb[46].mxu1 }
 0xd13   : > { %v3300_v30 = vpop.f32.mrb[47].mxu1  ;;  %v2059_v31 = vsel %vm663_vm2, %v1999_v25, -inf }
 0xd14   : > { %2060 = vmax.xlane.f32.xlu0 %v2059_v31 }
 0xd18   : > { %v2047_v32 = vpop.f32.mrb[52].mxu0 }
 0xd19   : > { %v2048_v33 = vadd.f32 %v2047_v32, %v3814_v7  ;;  %v3305_v0 = vpop.f32.mrb[53].mxu0  ;;  %v2978_v7 = vld [vmem:[%s4317_s3 + $0xf] ss:$0 sm:$0xff] }
 0xd1a   : > { %v2050_v35 = vpop.f32.mrb[54].mxu0 }
 0xd1b   : > { %v3306_v37 = vpop.f32.mrb[55].mxu0  ;;  %v2062_v38 = vsel %vm663_vm2, %v2048_v33, -inf }
 0xd1c   : > { %2063 = vmax.xlane.f32.xlu1 %v2062_v38  ;;  %v2988_v37 = vld [vmem:[%s4319_s5 + $0x14] sm:$0xf] }
 0xd1d   : > { %v2360_v38 = vsel %vm915_vm4, %v2988_v37, 0 }
 0xd2a   : > { %1833 = vrot.lane.b32.xlu0 %v2975_v39, %s3594_s8  ;;  %v2987_v39 = vld [vmem:[%s4319_s5 + $0x10] sm:$0xf] }
 0xd2d   : > { %1835 = vrot.lane.b32.xlu1 %v2976_v42, %s3594_s8  ;;  %v2314_v42 = vsel %vm915_vm4, %v2987_v39, 0 }
 0xd2e   : > { %1839 = vrot.lane.b32.xlu0 %v2978_v7, %s3594_s8  ;;  %v2990_v7 = vld [vmem:[%s4319_s5 + $0x1c] sm:$0xf] }
 0xd31   : > { %1837 = vrot.lane.b32.xlu1 %v2977_v43, %s3594_s8  ;;  %s3017_s8 = sshll.u32 %s3659_s28, 4  ;;  %s3597_s28 = smov [#allocation2]  }
 0xd32   : > { %s4272_s15 = scalar_lea.hbm %s4321_s7, %s3017_s8  ;;  %s3530_s14 = sshll.u32 %s3597_s28, 4  ;;  %s3531_s14 = int_to_ptr.vmem [resolvable:$false] %s3530_s14 }
 0xd33   : > { %s3532_s17 = scalar_lea.vmem %s3531_s14, 32 }
 0xd91   : > { %v2055_v47 = vpop.xlane.xlu1 %2054 }
 0xd92   : > { %v2065_v59 = vsub.f32 %v1901_v14, %v2055_v47  ;;  %v2452_v47 = vsel %vm915_vm4, %v2990_v7, 0 }
 0xd94   : > { %v2069_v60 = vmul.f32 1.442695, %v2065_v59 }
 0xd99   : > { %v2058_v44 = vpop.xlane.xlu0 %2057 }
 0xd9a   : > { %v2066_v56 = vsub.f32 %v1950_v19, %v2058_v44 }
 0xd9c   : > { %v2071_v57 = vmul.f32 1.442695, %v2066_v56 }
 0xd9e   : > { %3502 = vpow2.f32 %v2071_v57 }
 0xda1   : > { %v2061_v45 = vpop.xlane.xlu0 %2060 }
 0xda2   : > { %v2067_v36 = vsub.f32 %v1999_v25, %v2061_v45 }
 0xda4   : > { %v2073_v58 = vmul.f32 1.442695, %v2067_v36 }
 0xda5   : > { %v1834_v48 = vpop.permute.xlu0 %1833 }
 0xda6   : > { %v1845_v49 = vadd.f32 %v1834_v48, %v4032_v34  ;;  %3504 = vpow2.f32 %v2073_v58 }
 0xda7   : > { %3506 = vpow2.f32 %v2069_v60 }
 0xda8   : > { %v2101_v50 = vpack.c.bf16 %v1845_v49, %v1845_v49  ;;  %v3503_v34 = vpop.eup %3502 }
 0xda9   : > { %v2064_v52 = vpop.xlane.xlu1 %2063  ;;  %v2080_v62 = vsel %vm663_vm2, %v3503_v34, 0.0  ;;  %v1840_v5 = vpop.permute.xlu0 %1839 }
 0xdaa   : > { %2106 = vrot.lane.b32.xlu0 %v2101_v50, %s3595_s21  ;;  %v2068_v26 = vsub.f32 %v2048_v33, %v2064_v52  ;;  %v1848_v6 = vadd.f32 %v1840_v5, %v4047_v51  ;;  %v2989_v50 = vld [vmem:[%s4319_s5 + $0x18] sm:$0xf] }
 0xdac   : > { %v2075_v61 = vmul.f32 1.442695, %v2068_v26  ;;  %v2104_v10 = vpack.c.bf16 %v1848_v6, %v1848_v6 }
 0xdad   : > { %v1836_v53 = vpop.permute.xlu1 %1835 }
 0xdae   : > { %v1846_v54 = vadd.f32 %v1836_v53, %v4037_v40  ;;  %3508 = vpow2.f32 %v2075_v61 }
 0xdb0   : > { %v2102_v55 = vpack.c.bf16 %v1846_v54, %v1846_v54  ;;  %v3505_v63 = vpop.eup %3504 }
 0xdb1   : > { %v2083_v40 = vsel %vm663_vm2, %v3505_v63, 0.0  ;;  %v3507_v1 = vpop.eup %3506  ;;  %v1838_v11 = vpop.permute.xlu1 %1837 }
 0xdb2   : > { %2155 = vrot.lane.b32.xlu1 %v2102_v55, %s3595_s21  ;;  %v2077_v2 = vsel %vm663_vm2, %v3507_v1, 0.0  ;;  %v1847_v12 = vadd.f32 %v1838_v11, %v4042_v46  ;;  %v2406_v55 = vsel %vm915_vm4, %v2989_v50, 0  ;;  %v3468_v50 = vld [vmem:[%s4320_s6 + $0x70] sm:$0xff]  }
 0xdb4   : > { %v2103_v13 = vpack.c.bf16 %v1847_v12, %v1847_v12 }
 0xdb8   : > { %v3509_v3 = vpop.eup %3508 }
 0xdb9   : > { %v2086_v4 = vsel %vm663_vm2, %v3509_v3, 0.0 }
 0xdc9   : > { %2081 = vadd.xlane.f32.xlu0 %v2080_v62 }
 0xdcd   : > { %2084 = vadd.xlane.f32.xlu0 %v2083_v40 }
 0xdd6   : > { %2078 = vadd.xlane.f32.xlu1 %v2077_v2 }
 0xdda   : > { %2087 = vadd.xlane.f32.xlu1 %v2086_v4 }
 0xde3   : > { %2253 = vrot.lane.b32.xlu0 %v2104_v10, %s3595_s21 }
 0xdeb   : > { %2204 = vrot.lane.b32.xlu1 %v2103_v13, %s3595_s21  ;;  %s281_s21 = scalar_lea.vmem [#allocation2], %s280_s20 }
 0xdec   : > { %s2805_s22 = sshll.u32 %s281_s21, 4  ;;  %s4274_s22 = int_to_ptr.vmem [resolvable:$true] %s2805_s22 }
 0xded   : > { %s3526_s13 = scalar_lea.vmem %s4274_s22, 16  ;;  %p3533_p0 = scmp.lt.s32.totalorder %s4274_s22, %s3531_s14 }
 0xdee   : > { %p3527_p11 = scmp.ne.s32.totalorder %s4274_s22, %s3526_s13  ;;  %p3534_p1 = scmp.lt.s32.totalorder %s3532_s17, %s3526_s13 }
 0xdf0   : > { %p3528_p12 = pnand %p3527_p11, %p3676_p5  ;;  %p3535_p2 = por %p3534_p1, %p3533_p0 }
 0xdf2   : > { %p3529_p13 = pneg %p3528_p12 }
 0xdf4   : > { %p3536_p3 = pnand %p3535_p2, %p3529_p13 }
 0xe1c   : > { %v2107_v27 = vpop.permute.xlu0 %2106 }
 0xe1d   : > { %v2112_v14 = vsel %vm915_vm4, %v2107_v27, 0 }
 0xe1e   : > { %3308 = vmatpush3.bf16.msra.mxu1 %v2112_v14 }
 0xe1f   : > { %3319 = vmatprep.subr.bf16.mxu1 %v3590_v9 }
 0xe24   : > { %v2156_v41 = vpop.permute.xlu1 %2155 }
 0xe25   : > { %v2161_v15 = vsel %vm915_vm4, %v2156_v41, 0 }
 0xe26   : > { %3314 = vmatpush3.bf16.msra.mxu0 %v2161_v15 }
 0xe27   : > { %3325 = vmatprep.subr.bf16.mxu0 %v3590_v9 }
 0xe56   : > { %v2082_v51 = vpop.xlane.xlu0 %2081 }
 0xe57   : > { %3510 = vrcp.f32 %v2082_v51 }
 0xe5a   : > { %v2085_v16 = vpop.xlane.xlu0 %2084 }
 0xe5e   : > { %v2254_v18 = vpop.permute.xlu0 %2253 }
 0xe5f   : > { %v2259_v21 = vsel %vm915_vm4, %v2254_v18, 0 }
 0xe61   : > { %v3511_v17 = vpop.eup %3510 }
 0xe62   : > { %v2094_v46 = vmul.f32 %v3511_v17, %v3503_v34 }
 0xe63   : > { %v2079_v19 = vpop.xlane.xlu1 %2078 }
 0xe64   : > { %3512 = vrcp.f32 %v2079_v19  ;;  %v2098_v20 = vpack.c.bf16 %v2094_v46, %v2094_v46 }
 0xe65   : > { %3514 = vrcp.f32 %v2085_v16 }
 0xe66   : > { %3316 = vmatmul.mubr.msk.bf16.vlgmr.msra.gmra.mrb[56].mxu0 %vm663_vm2, %v2098_v20 }
 0xe67   : > { %3326 = vmatpush3.bf16.msra.mxu0 %v2259_v21  ;;  %v2088_v22 = vpop.xlane.xlu1 %2087  ;;  %3327 = vmatprep.mubr.msk.bf16.mxu0 %vm3591_vm1, %v3590_v9 }
 0xe68   : > { %3516 = vrcp.f32 %v2088_v22  ;;  %3337 = vmatprep.subr.bf16.mxu0 %v3590_v9 }
 0xe6b   : > { %v2205_v25 = vpop.permute.xlu1 %2204 }
 0xe6c   : > { %v2210_v32 = vsel %vm915_vm4, %v2205_v25, 0 }
 0xe6e   : > { %v3513_v23 = vpop.eup %3512 }
 0xe6f   : > { %v2093_v24 = vmul.f32 %v3513_v23, %v3507_v1  ;;  %v3515_v28 = vpop.eup %3514  ;;  %v2995_v23 = vld [vmem:[%s4316_s2 + $0x9] ss:$0 sm:$0xff] }
 0xe70   : > { %v2095_v33 = vmul.f32 %v3515_v28, %v3505_v63 }
 0xe71   : > { %v2097_v29 = vpack.c.bf16 %v2093_v24, %v2093_v24 }
 0xe72   : > { %v3517_v30 = vpop.eup %3516  ;;  %v2099_v35 = vpack.c.bf16 %v2095_v33, %v2095_v33 }
 0xe73   : > { %v2096_v31 = vmul.f32 %v3517_v30, %v3509_v3  ;;  %3310 = vmatmul.mubr.msk.bf16.vlgmr.msra.gmra.mrb[48].mxu1 %vm663_vm2, %v2097_v29 }
 0xe74   : > { %3320 = vmatpush3.bf16.msra.mxu1 %v2210_v32  ;;  %3321 = vmatprep.mubr.msk.bf16.mxu1 %vm3591_vm1, %v3590_v9 }
 0xe75   : > { %v2100_v0 = vpack.c.bf16 %v2096_v31, %v2096_v31  ;;  %3331 = vmatprep.subr.bf16.mxu1 %v3590_v9 }
 0xe77   : > { %3328 = vmatmul.mubr.msk.bf16.vlgmr.msra.gmra.mrb[60].mxu0 %vm663_vm2, %v2100_v0  ;;  %v3464_v0 = vld [vmem:[%s4320_s6 + $0x50] sm:$0xff]  }
 0xe78   : > { %3339 = vmatprep.mubr.msk.bf16.mxu0 %vm3591_vm1, %v3590_v9  ;;  %3338 = vmatpush3.bf16.msra.mxu0 %v2360_v38 }
 0xe79   : > { %3349 = vmatprep.subr.bf16.mxu0 %v3590_v9 }
 0xe7b   : > { %3322 = vmatmul.mubr.msk.bf16.vlgmr.msra.gmra.mrb[52].mxu1 %vm663_vm2, %v2099_v35 }
 0xe7c   : > { %3333 = vmatprep.mubr.msk.bf16.mxu1 %vm3591_vm1, %v3590_v9  ;;  %3332 = vmatpush3.bf16.msra.mxu1 %v2314_v42  ;;  %v2996_v42 = vld [vmem:[%s4316_s2 + $0xa] ss:$0 sm:$0xff] }
 0xe7d   : > { %3343 = vmatprep.subr.bf16.mxu1 %v3590_v9 }
 0xf39   : > { %v2197_v43 = vpop.f32.mrb[56].mxu0 }
 0xf3a   : > { %v2302_v44 = vpack.c.bf16 %v2197_v43, %v2197_v43  ;;  %v3317_v45 = vpop.f32.mrb[57].mxu0  ;;  %v2997_v43 = vld [vmem:[%s4316_s2 + $0xb] ss:$0 sm:$0xff] }
 0xf3b   : > { %v2200_v48 = vpop.f32.mrb[58].mxu0 }
 0xf3c   : > { %v3318_v49 = vpop.f32.mrb[59].mxu0  ;;  %3340 = vmatmul.mubr.msk.bf16.vlgmr.msra.gmra.mrb[64].mxu0 %vm663_vm2, %v2302_v44  ;;  %v3466_v48 = vld [vmem:[%s4320_s6 + $0x60] sm:$0xff]  }
 0xf3d   : > { %3350 = vmatpush3.bf16.msra.mxu0 %v2452_v47  ;;  %3351 = vmatprep.mubr.msk.bf16.mxu0 %vm3591_vm1, %v3590_v9  ;;  %v3467_v49 = vld [vmem:[%s4320_s6 + $0x68] sm:$0xff]  }
 0xf3e   : > { %3363 = vmatprep.subr.bf16.mxu0 %v3590_v9 }
 0xf46   : > { %v2148_v52 = vpop.f32.mrb[48].mxu1 }
 0xf47   : > { %v2301_v53 = vpack.c.bf16 %v2148_v52, %v2148_v52  ;;  %v3311_v54 = vpop.f32.mrb[49].mxu1  ;;  %v3469_v52 = vld [vmem:[%s4320_s6 + $0x78] sm:$0xff]  }
 0xf48   : > { %v2151_v56 = vpop.f32.mrb[50].mxu1  ;;  %v3471_v54 = vld [vmem:[%s4320_s6 + $0x88] sm:$0xff]  }
 0xf49   : > { %v3312_v57 = vpop.f32.mrb[51].mxu1  ;;  %3334 = vmatmul.mubr.msk.bf16.vlgmr.msra.gmra.mrb[56].mxu1 %vm663_vm2, %v2301_v53  ;;  %v3470_v53 = vld [vmem:[%s4320_s6 + $0x80] sm:$0xff]   ;;  %v3473_v56 = vld [vmem:[%s4320_s6 + $0x98] sm:$0xff]  }
 0xf4a   : > { %v2295_v36 = vpop.f32.mrb[60].mxu0  ;;  %3344 = vmatpush3.bf16.msra.mxu1 %v2406_v55  ;;  %3345 = vmatprep.mubr.msk.bf16.mxu1 %vm3591_vm1, %v3590_v9  ;;  %v3472_v55 = vld [vmem:[%s4320_s6 + $0x90] sm:$0xff]   ;;  %v2998_v57 = vld [vmem:[%s4316_s2 + $0xd] ss:$0 sm:$0xff] }
 0xf4b   : > { %v2304_v58 = vpack.c.bf16 %v2295_v36, %v2295_v36  ;;  %v3329_v59 = vpop.f32.mrb[61].mxu0  ;;  %3355 = vmatprep.subr.bf16.mxu1 %v3590_v9 }
 0xf4c   : > { %v2298_v60 = vpop.f32.mrb[62].mxu0 }
 0xf4d   : > { %v3330_v26 = vpop.f32.mrb[63].mxu0  ;;  %3352 = vmatmul.mubr.msk.bf16.vlgmr.msra.gmra.mrb[68].mxu0 %vm663_vm2, %v2304_v58 }
 0xf4e   : > { %v2246_v34 = vpop.f32.mrb[52].mxu1  ;;  %3379 = vmatprep.mubr.msk.bf16.mxu0 %vm3591_vm1, %v3590_v9  ;;  %3364 = vmatpush3.bf16.msra.mxu0 %v3466_v48 }
 0xf4f   : > { %v2303_v61 = vpack.c.bf16 %v2246_v34, %v2246_v34  ;;  %v3323_v62 = vpop.f32.mrb[53].mxu1  ;;  %3365 = vmatprep.subr.bf16.mxu0 %v3590_v9 }
 0xf50   : > { %v2249_v63 = vpop.f32.mrb[54].mxu1 }
 0xf51   : > { %v3324_v40 = vpop.f32.mrb[55].mxu1  ;;  %3346 = vmatmul.mubr.msk.bf16.vlgmr.msra.gmra.mrb[60].mxu1 %vm663_vm2, %v2303_v61 }
 0xf52   : > { %3359 = vmatprep.mubr.msk.bf16.mxu1 %vm3591_vm1, %v3590_v9  ;;  %3356 = vmatpush3.bf16.msra.mxu1 %v3464_v0 }
 0xf53   : > { %3357 = vmatprep.subr.bf16.mxu1 %v3590_v9  ;;  %3366 = vmatpush3.bf16.msra.mxu0 %v3467_v49 }
 0xf54   : > { %3367 = vmatprep.subr.bf16.mxu0 %v3590_v9 }
 0xf57   : > { %3368 = vmatpush3.bf16.msra.mxu0 %v3468_v50 }
 0xf58   : > { %3369 = vmatprep.subr.bf16.mxu0 %v3590_v9 }
 0xf5b   : > { %3370 = vmatpush3.bf16.msra.mxu0 %v3469_v52 }
 0xf5c   : > { %3371 = vmatprep.subr.bf16.mxu0 %v3590_v9 }
 0xf5f   : > { %3372 = vmatpush3.bf16.msra.mxu0 %v3470_v53 }
 0xf60   : > { %3373 = vmatprep.subr.bf16.mxu0 %v3590_v9 }
 0xf63   : > { %3374 = vmatpush3.bf16.msra.mxu0 %v3471_v54 }
 0xf64   : > { %3375 = vmatprep.subr.bf16.mxu0 %v3590_v9 }
 0xf67   : > { %3376 = vmatpush3.bf16.msra.mxu0 %v3472_v55 }
 0xf68   : > { %3377 = vmatprep.subr.bf16.mxu0 %v3590_v9 }
 0xf6b   : > { %3378 = vmatpush3.bf16.msra.mxu0 %v3473_v56 }
0x100f   : > { %v2396_v1 = vpop.f32.mrb[64].mxu0 }
0x1010   : > { %v3341_v2 = vpop.f32.mrb[65].mxu0  ;;  %v2495_v6 = vsel %vm335_vm0, %v2396_v1, 0.0 }
0x1011   : > { %v2399_v3 = vpop.f32.mrb[66].mxu0 }
0x1012   : > { %v3342_v4 = vpop.f32.mrb[67].mxu0  ;;  %v3003_v3 = vld [vmem:[%s4316_s2 + $0xc] ss:$0 sm:$0xff] }
0x101c   : > { %v2350_v5 = vpop.f32.mrb[56].mxu1 }
0x101d   : > { %v2494_v10 = vsel %vm335_vm0, %v2350_v5, 0.0  ;;  %v3335_v11 = vpop.f32.mrb[57].mxu1 }
0x101e   : > { %v2496_v12 = vadd.f32 %v2495_v6, %v2494_v10  ;;  %v2353_v13 = vpop.f32.mrb[58].mxu1 }
0x101f   : > { %v3336_v27 = vpop.f32.mrb[59].mxu1 }
0x1020   : > { %v2488_v14 = vpop.f32.mrb[68].mxu0  ;;  %v3596_v27 = vmov 0  }
0x1021   : > { %v3353_v41 = vpop.f32.mrb[69].mxu0  ;;  %v2499_v20 = vsel %vm335_vm0, %v2488_v14, 0.0  ;;  %3437 = vset.pattern.permute.xlu0 %v3596_v27  ;;  %v292_v14 = vld [vmem:[%s289_s29] sm:$0xff] }
0x1022   : > { %v2491_v15 = vpop.f32.mrb[70].mxu0 }
0x1023   : > { %v3354_v51 = vpop.f32.mrb[71].mxu0 }
0x1024   : > { %v2442_v16 = vpop.f32.mrb[60].mxu1 }
0x1025   : > { %v2497_v17 = vsel %vm335_vm0, %v2442_v16, 0.0  ;;  %v3347_v46 = vpop.f32.mrb[61].mxu1 }
0x1026   : > { %v2498_v18 = vadd.f32 %v2497_v17, %v2496_v12  ;;  %v2445_v19 = vpop.f32.mrb[62].mxu1  ;;  %v3474_v46 = vld [vmem:[%s4320_s6 + $0xa0] sm:$0xff]  }
0x1027   : > { %v3348_v21 = vpop.f32.mrb[63].mxu1 }
0x1028   : > { %v2500_v22 = vadd.f32 %v2499_v20, %v2498_v18  ;;  %v3475_v18 = vld [vmem:[%s4320_s6 + $0xa8] sm:$0xff]  }
0x102a   : > { %v2501_v24 = vadd.f32 %v2500_v22, %v3976_v8  ;;  %v3465_v8 = vld [vmem:[%s4320_s6 + $0x58] sm:$0xff]  }
0x102b   : > { %3358 = vmatpush3.bf16.msra.mxu1 %v3465_v8 }
0x102c   : > { %v4184_v25 = vadd.f32 %v2995_v23, %v2501_v24  ;;  %3383 = vmatprep.subr.bf16.mxu1 %v3590_v9  ;;  %v3012_v23 = vld [vmem:[%s4316_s2 + $0xe] ss:$0 sm:$0xff] }
0x102e   : > { %v2507_v28 = vsel %vm335_vm0, %v4184_v25, 0.0 }
0x102f   : > { %2508 = vadd.xlane.f32.xlu1 %v2507_v28 }
0x10bc   : > { %v2509_v29 = vpop.xlane.xlu1 %2508 }
0x10bd   : > { %v2510_v30 = vmul.f32 0.03125, %v2509_v29 }
0x10bf   : > { %v2511_v31 = vsub.f32 %v4184_v25, %v2510_v30 }
0x10c1   : > { %v2512_v32 = vmul.f32 %v2511_v31, %v2511_v31 }
0x10c3   : > { %v2513_v33 = vsel %vm335_vm0, %v2512_v32, 0.0 }
0x10c4   : > { %2514 = vadd.xlane.f32.xlu0 %v2513_v33 }
0x1151   : > { %v2515_v35 = vpop.xlane.xlu0 %2514 }
0x1152   : > { %v2516_v37 = vmul.f32 0.03125, %v2515_v35 }
0x1154   : > { %v2517_v38 = vadd.f32 1e-05, %v2516_v37 }
0x1156   : > { %3518 = vrsqrt.f32 %v2517_v38 }
0x1160   : > { %v3519_v39 = vpop.eup %3518 }
0x1161   : > { %v2519_v7 = vmul.f32 %v3519_v39, %v2511_v31 }
0x1163   : > { %v2524_v44 = vmul.f32 %v2996_v42, %v2519_v7 }
0x1165   : > { %v2529_v45 = vadd.f32 %v2997_v43, %v2524_v44 }
0x1167   : > { %v2530_v47 = vpack.c.bf16 %v2529_v45, %v2529_v45 }
0x1169   : > { %3360 = vmatmul.mubr.msk.bf16.vlgmr.msra.gmra.mrb[64].mxu1 %vm335_vm0, %v2530_v47 }
0x116a   : > { %3387 = vmatprep.mubr.msk.bf16.mxu1 %vm3591_vm1, %v3590_v9  ;;  %3384 = vmatpush3.bf16.msra.mxu1 %v3474_v46 }
0x116b   : > { %3385 = vmatprep.subr.bf16.mxu1 %v3590_v9  ;;  %v3013_v9 = vld [vmem:[%s4316_s2 + $0xf] ss:$0 sm:$0xff] }
0x116e   : > { %3386 = vmatpush3.bf16.msra.mxu1 %v3475_v18 }
0x123c   : > { %v2584_v36 = vpop.f32.mrb[64].mxu1 }
0x123d   : > { %v2585_v58 = vadd.f32 %v2998_v57, %v2584_v36  ;;  %v3361_v59 = vpop.f32.mrb[65].mxu1 }
0x123e   : > { %v2587_v60 = vpop.f32.mrb[66].mxu1 }
0x123f   : > { %v3002_v26 = vmul.f32 -1.702, %v2585_v58  ;;  %v3362_v34 = vpop.f32.mrb[67].mxu1 }
0x1241   : > { %v2592_v61 = vmul.f32 1.442695, %v3002_v26 }
0x1243   : > { %3520 = vpow2.f32 %v2592_v61 }
0x124d   : > { %v3521_v62 = vpop.eup %3520 }
0x124e   : > { %v2594_v63 = vadd.f32 1.0, %v3521_v62 }
0x1250   : > { %3522 = vrcp.f32 %v2594_v63 }
0x125a   : > { %v3523_v40 = vpop.eup %3522 }
0x125b   : > { %v2597_v1 = vmul.f32 %v3523_v40, %v2585_v58 }
0x125d   : > { %v2598_v2 = vpack.c.bf16 %v2597_v1, %v2597_v1 }
0x125f   : > { %3380 = vmatmul.mubr.bf16.vlgmr.msra.gmra.mrb[72].mxu0 %v2598_v2 }
0x1332   : > { %v2685_v4 = vpop.f32.mrb[72].mxu0 }
0x1333   : > { %v2686_v5 = vadd.f32 %v3003_v3, %v2685_v4  ;;  %v3381_v6 = vpop.f32.mrb[73].mxu0 }
0x1334   : > { %v2688_v10 = vpop.f32.mrb[74].mxu0 }
0x1335   : > { %v3382_v11 = vpop.f32.mrb[75].mxu0  ;;  %v2691_v12 = vadd.f32 %v2686_v5, %v4184_v25 }
0x1337   : > { %v2694_v13 = vsel %vm335_vm0, %v2691_v12, 0.0 }
0x1338   : > { %2695 = vadd.xlane.f32.xlu0 %v2694_v13 }
0x134e   : > { %2719 = vperm.xlu0 %3437, %v292_v14  }
0x13c5   : > { %v2696_v41 = vpop.xlane.xlu0 %2695 }
0x13c6   : > { %v2697_v15 = vmul.f32 0.03125, %v2696_v41 }
0x13c8   : > { %v2698_v51 = vsub.f32 %v2691_v12, %v2697_v15 }
0x13ca   : > { %v2699_v16 = vmul.f32 %v2698_v51, %v2698_v51 }
0x13cc   : > { %v2700_v17 = vsel %vm335_vm0, %v2699_v16, 0.0 }
0x13cd   : > { %2701 = vadd.xlane.f32.xlu1 %v2700_v17  ;;  %v2720_v28 = vpop.permute.xlu0 %2719 }
0x145a   : > { %v2702_v19 = vpop.xlane.xlu1 %2701 }
0x145b   : > { %v2703_v20 = vmul.f32 0.03125, %v2702_v19 }
0x145d   : > { %v2704_v21 = vadd.f32 1e-05, %v2703_v20 }
0x145f   : > { %3524 = vrsqrt.f32 %v2704_v21 }
0x1469   : > { %v3525_v22 = vpop.eup %3524 }
0x146a   : > { %v2706_v24 = vmul.f32 %v3525_v22, %v2698_v51 }
0x146c   : > { %v2711_v25 = vmul.f32 %v3012_v23, %v2706_v24 }
0x146e   : > { %v2716_v29 = vadd.f32 %v3013_v9, %v2711_v25 }
0x1470   : > { %v2722_v30 = vmul.f32 %v2720_v28, %v2716_v29 }
0x1472   : > { %v2723_v31 = vsel %vm335_vm0, %v2722_v30, 0.0 }
0x1473   : > { %v2724_v32 = vrot.slane %v2723_v31, 4 }
0x1475   : > { %v2725_v33 = vadd.f32 %v2724_v32, %v2723_v31 }
0x1477   : > { %v2726_v0 = vrot.slane %v2725_v33, 2 }
0x1479   : > { %v2727_v8 = vadd.f32 %v2726_v0, %v2725_v33 }
0x147b   : > { %v2728_v35 = vrot.slane %v2727_v8, 1 }
0x147d   : > { %v2729_v37 = vadd.f32 %v2728_v35, %v2727_v8 }
0x147f   : > { %v2734_v38 = vpack.c.bf16 %v2729_v37, %v2729_v37 }
0x1481   : > { %3388 = vmatmul.mubr.msk.bf16.vlgmr.msra.gmra.mrb[68].mxu1 %vm335_vm0, %v2734_v38 }
0x1554   : > { %v2784_v39 = vpop.f32.mrb[68].mxu1 }
0x1555   : > { %2791 = vst.msk [vmem:[%s281_s21] sm:$0x1] %vm2790_vm5, %v2784_v39  ;;  %v3389_v42 = vpop.f32.mrb[69].mxu1 }
0x1556   : > { %v2787_v7 = vpop.f32.mrb[70].mxu1 }
0x1557   : > { %3539 = shalt.err (!%p3536_p3)
}
0x1558   : > { %s3540_s18 = scalar_lea.hbm %s4272_s15, 16  ;;  %s3544_s20 = scalar_lea.hbm %s4321_s7, 32 }
0x1559   : > { %p3541_p4 = scmp.ne.s32.totalorder %s4272_s15, %s3540_s18  ;;  %p3545_p9 = scmp.lt.u32.totalorder %s4272_s15, %s4321_s7 }
0x155a   : > { %p3546_p10 = scmp.lt.u32.totalorder %s3544_s20, %s3540_s18  ;;  %p3548_p12 = scmp.lt.u32.totalorder %s3540_s18, %s4272_s15 }
0x155b   : > { %p3542_p7 = pnand %p3541_p4, %p3676_p5 }
0x155c   : > { %p3547_p11 = por %p3546_p10, %p3545_p9 }
0x155d   : > { %p3543_p8 = pneg %p3542_p7 }
0x155e   : > { %p3549_p13 = por %p3548_p12, %p3547_p11 }
0x1560   : > { %p3550_p0 = pnand %p3549_p13, %p3543_p8 }
0x1562   : > { %3553 = shalt.err (!%p3550_p0)
}
0x1563   : > { %3391 = dma.vmem_to_hbm [thread:$0]  (%p3676_p5), %s4274_s22, 16, %s4272_s15, %s2793_s16   ;;  %v3390_v43 = vpop.f32.mrb[71].mxu1 }
0x1564 PF: > { %p3397_p1 = scmp.ge.s32.totalorder %s3588_s27, 2  ;;  %s2817_s23 = sand.u32 1, %s3576_s24  }
0x1565   : > { %s2818_s29 = scalar_lea.sflag [#allocation3], %s2817_s23 }
0x1566   : > { %p3394_p2 = pnand %p3397_p1, %p3680_p6 }
0x1568   : > { %3571 = dma.done.wait (!%p3394_p2), %s2818_s29, 16  }
0x1569   : > { %3573 = vsyncadd (!%p3394_p2), %s2818_s29, 4294967280  ;;  %p17_p3 = scmp.ge.s32.totalorder %s3663_s30, 4   ;;  %s4324_s24 = smov %s3580_s25 }
0x156a   : > { %s4325_s25 = smov %s3584_s26  ;;  %s4326_s26 = smov %s3674_s10 }
0x156b   : > { %s4327_s27 = smov %s3663_s30  ;;  %19 = sbr.rel (!%p17_p3) target bundleno = 3 (0x3), region = 91 }
0x1572   :  { %2822 = vsyncpa [#allocation3], 1 }
0x1573   :  { %2824 = vsyncpa [#allocation3 + $0x1], 1 }

</bundles_post_ra>
